<compile_context>
chip_gen: v6e
topology: v6e:2x2x1
jax: 0.10.0
libtpu: 0.0.40
codegen_flags: <defaults>
</compile_context>

<pallas_src>
import jax
import jax.numpy as jnp
from jax import lax
from jax.experimental import pallas as pl
from jax.experimental.pallas import tpu as pltpu


def _round_up(x, m):
    return ((x + m - 1) // m) * m


# ---------------------------------------------------------------------------
# Kernel: one (batch_block, time_chunk) grid point
# ---------------------------------------------------------------------------
def lstm_kernel(xp_ref, h0_ref, c0_ref, w1h_ref, w2_ref, w3_ref,
                h_seq_ref, c_fin_ref, h_scr, c_scr):
    """Fused LSTMCell recurrence over one time chunk of one batch block.

    xp_ref   : (T_chunk, B_blk, Hp) f32  precomputed x_t @ W1x for this chunk
    h0_ref   : (B_blk, Hp)               initial hidden state
    c0_ref   : (B_blk, Hp)               initial cell state
    w1h_ref  : (Hp, Hp)                  fc1 weight, hidden part (in, out)
    w2_ref   : (Hp, Hp)                  fc2 weight (in, out)
    w3_ref   : (Hp, 4*Hp)                gate weight, per-gate lane-aligned
    h_seq_ref: (T_chunk, B_blk, Hp)      hidden states for this chunk (output)
    c_fin_ref: (B_blk, Hp)               final cell state (resident over t)
    h_scr, c_scr: (B_blk, Hp) f32        recurrent carry in VMEM scratch

    CORRECTNESS NOTE: the h/c carry in VMEM scratch requires the time axis
    (grid axis 1) to be iterated sequentially and innermost.  It must stay the
    LAST grid axis and be marked "arbitrary"; only the batch axis may be
    "parallel".  Reordering the grid would silently corrupt the recurrence.
    """
    t_blk = pl.program_id(1)

    @pl.when(t_blk == 0)
    def _init():
        h_scr[...] = h0_ref[...].astype(jnp.float32)
        c_scr[...] = c0_ref[...].astype(jnp.float32)

    cdt = w1h_ref.dtype                     # MXU compute dtype (f32 or bf16)
    Hp = c_scr.shape[1]
    T_chunk = xp_ref.shape[0]

    def _sigmoid(z):
        # sigmoid(z) == 0.5*(tanh(z/2)+1): tanh runs on the EUP slot, no VPU
        # divide on the serial tail of each timestep.
        return 0.5 * (jnp.tanh(0.5 * z) + 1.0)

    h = h_scr[...]
    c = c_scr[...]

    # Statically unrolled chunk loop (T_chunk is a small static constant, so
    # this is equivalent to lax.fori_loop(..., unroll=True) with static
    # indices -> all xp loads / h_seq stores are static, lane-dense slices).
    for tc in range(T_chunk):
        # x_act = relu(fc1([x, h]));  x part was hoisted (xp_ref is f32).
        a = xp_ref[tc] + jnp.dot(h.astype(cdt), w1h_ref[...],
                                 preferred_element_type=jnp.float32)
        a = jnp.maximum(a, 0.0)
        # x_act = relu(fc2(x_act))
        a = jnp.dot(a.astype(cdt), w2_ref[...],
                    preferred_element_type=jnp.float32)
        a = jnp.maximum(a, 0.0)
        # combined_conv = relu(W(x_act))
        cc = jnp.dot(a.astype(cdt), w3_ref[...],
                     preferred_element_type=jnp.float32)
        cc = jnp.maximum(cc, 0.0)

        # Gate slices fall on 128-lane-aligned boundaries (Hp % 128 == 0).
        i = _sigmoid(cc[:, 0 * Hp:1 * Hp])
        f = _sigmoid(cc[:, 1 * Hp:2 * Hp])
        o = _sigmoid(cc[:, 2 * Hp:3 * Hp])
        g = jnp.tanh(cc[:, 3 * Hp:4 * Hp])

        c = f * c + i * g
        h = o * jnp.tanh(c)
        h_seq_ref[tc] = h.astype(h_seq_ref.dtype)

    h_scr[...] = h
    c_scr[...] = c

    @pl.when(t_blk == pl.num_programs(1) - 1)
    def _finalize():
        c_fin_ref[...] = c.astype(c_fin_ref.dtype)


# ---------------------------------------------------------------------------
# Parameter preparation (done ONCE, not per forward call)
# ---------------------------------------------------------------------------
def prepare_params(w_fc1, w_fc2, w_W, input_dim, hidden_dim,
                   param_dtype=jnp.bfloat16):
    """Convert PyTorch (out, in) weights into padded (in, out) kernel layout.

    w_fc1: (H, Din + H), w_fc2: (H, H), w_W: (4H, H)
    Returns (w1x, w1h, w2, w3) with shapes
      (Dp, Hp), (Hp, Hp), (Hp, Hp), (Hp, 4*Hp),   Dp/Hp = round_up(..., 128).
    Default dtype is bf16 (f32 accumulation and f32 gate math in the kernel).
    """
    Dp = _round_up(input_dim, 128)
    Hp = _round_up(hidden_dim, 128)

    def pad2(w, rows, cols):
        return jnp.pad(w, ((0, rows - w.shape[0]), (0, cols - w.shape[1])))

    w1x = pad2(w_fc1[:, :input_dim].T, Dp, Hp)          # (Din, H) -> (Dp, Hp)
    w1h = pad2(w_fc1[:, input_dim:].T, Hp, Hp)          # (H, H)   -> (Hp, Hp)
    w2 = pad2(w_fc2.T, Hp, Hp)                          # (H, H)   -> (Hp, Hp)

    w3t = w_W.T                                         # (H, 4H)
    gates = [pad2(w3t[:, k * hidden_dim:(k + 1) * hidden_dim], Hp, Hp)
             for k in range(4)]
    w3 = jnp.concatenate(gates, axis=1)                 # (Hp, 4*Hp), gate-aligned

    return tuple(w.astype(param_dtype) for w in (w1x, w1h, w2, w3))


# ---------------------------------------------------------------------------
# Hardware queries / heuristics
# ---------------------------------------------------------------------------
def _vmem_cap_bytes():
    try:
        return int(pltpu.get_tpu_info().vmem_capacity_bytes)
    except Exception:
        return 64 << 20            # conservative: v7x per-core VMEM


def _min_batch_splits():
    # v7x has 2 TensorCores per chip: give the "parallel" b axis >= 2 blocks
    # so both cores get work.  Single-TC generations (v5e/v6e) keep 1 block.
    try:
        kind = jax.devices()[0].device_kind.lower()
        if "v7" in kind or "7x" in kind:
            return 2
    except Exception:
        pass
    return 1


def _pick_time_chunk(T, max_chunk):
    best = 1
    for d in range(1, min(T, max(1, max_chunk)) + 1):
        if T % d == 0:
            best = d
    return best


# ---------------------------------------------------------------------------
# Wrappers
# ---------------------------------------------------------------------------
def lstm_sequence_forward(x_seq, h0, c0, params, *, batch_block=512,
                          time_chunk=16, out_dtype=None):
    """Run T fused LSTMCell steps in a single pallas_call.

    x_seq: (T, B, Din), h0/c0: (B, H).  Returns (h_seq (T,B,H), c_final (B,H)).
    """
    T, B, D = x_seq.shape
    H = h0.shape[1]
    w1x, w1h, w2, w3 = params
    Dp, Hp = w1x.shape
    out_dtype = x_seq.dtype if out_dtype is None else out_dtype

    # ---- Hoisted, fully parallel input projection (one big XLA GEMM). ----
    x_pad = jnp.pad(x_seq, ((0, 0), (0, 0), (0, Dp - D)))
    xproj = jnp.einsum("tbd,dh->tbh", x_pad.astype(w1x.dtype), w1x,
                       preferred_element_type=jnp.float32,
                       precision=lax.Precision.HIGHEST)        # (T, B, Hp) f32

    # ---- Batch blocking (>= 2 blocks on v7x so both TCs get work). ----
    B8 = _round_up(B, 8)
    splits = _min_batch_splits()
    if splits > 1 and B8 >= 8 * splits:
        cap = _round_up(-(-B8 // splits), 8)
    else:
        cap = B8
    B_blk = max(8, min(_round_up(batch_block, 8), cap))

    T_chunk = _pick_time_chunk(T, time_chunk)
    nt = T // T_chunk

    # ---- VMEM budget, derived from hardware (not a fixed 96 MiB cap). ----
    vmem_cap = _vmem_cap_bytes()
    usable = max(vmem_cap - (8 << 20), 16 << 20)

    w_bytes = sum(int(w.size) * w.dtype.itemsize for w in (w1h, w2, w3))
    hseq_item = jnp.dtype(out_dtype).itemsize
    hc_item = h0.dtype.itemsize + c0.dtype.itemsize

    def _needed(b_blk, w_mult):
        xp_blk = T_chunk * b_blk * Hp * 4
        hseq_blk = T_chunk * b_blk * Hp * hseq_item
        hc0_blk = b_blk * Hp * hc_item
        cfin_blk = b_blk * Hp * c0.dtype.itemsize
        scratch = 2 * b_blk * Hp * 4
        return (w_mult * w_bytes
                + 2 * (xp_blk + hseq_blk + hc0_blk + cfin_blk) + scratch)

    # Shrink the batch block if the worst-case (double-buffered weights)
    # working set would not fit the physical VMEM of this generation.
    while B_blk > 8 and _needed(B_blk, 2) > usable:
        B_blk = max(8, _round_up(B_blk // 2, 8))

    Bp = _round_up(B8, B_blk)
    nb = Bp // B_blk

    xproj_p = jnp.pad(xproj, ((0, 0), (0, Bp - B), (0, 0)))
    h0_p = jnp.pad(h0, ((0, Bp - B), (0, Hp - H)))
    c0_p = jnp.pad(c0, ((0, Bp - B), (0, Hp - H)))

    def run(single_buffer_weights):
        if single_buffer_weights:
            # Constant index_maps -> double-buffering buys nothing; keep one
            # resident copy of each weight in VMEM.
            def w_spec(shape):
                return pl.BlockSpec(shape, lambda b, t: (0, 0),
                                    pipeline_mode=pl.Buffered(1))
            w_mult = 1
        else:
            def w_spec(shape):
                return pl.BlockSpec(shape, lambda b, t: (0, 0))
            w_mult = 2

        vmem_limit = int(min(max(_needed(B_blk, w_mult) + (4 << 20), 32 << 20),
                             usable))

        grid_spec = pltpu.PrefetchScalarGridSpec(
            num_scalar_prefetch=0,
            # t (the recurrence) MUST stay the last grid axis and "arbitrary";
            # the VMEM h/c carry relies on it iterating sequentially innermost.
            grid=(nb, nt),
            in_specs=[
                pl.BlockSpec((T_chunk, B_blk, Hp), lambda b, t: (t, b, 0)),  # xproj
                pl.BlockSpec((B_blk, Hp), lambda b, t: (b, 0)),              # h0
                pl.BlockSpec((B_blk, Hp), lambda b, t: (b, 0)),              # c0
                w_spec((Hp, Hp)),                                            # w1h
                w_spec((Hp, Hp)),                                            # w2
                w_spec((Hp, 4 * Hp)),                                        # w3
            ],
            out_specs=[
                pl.BlockSpec((T_chunk, B_blk, Hp), lambda b, t: (t, b, 0)),  # h_seq
                pl.BlockSpec((B_blk, Hp), lambda b, t: (b, 0)),              # final c
            ],
            scratch_shapes=[
                pltpu.VMEM((B_blk, Hp), jnp.float32),   # h carry
                pltpu.VMEM((B_blk, Hp), jnp.float32),   # c carry
            ],
        )

        return pl.pallas_call(
            lstm_kernel,
            grid_spec=grid_spec,
            out_shape=(
                jax.ShapeDtypeStruct((T, Bp, Hp), out_dtype),
                jax.ShapeDtypeStruct((Bp, Hp), c0.dtype),
            ),
            compiler_params=pltpu.CompilerParams(
                dimension_semantics=("parallel", "arbitrary"),
                vmem_limit_bytes=vmem_limit,
            ),
        )(xproj_p, h0_p, c0_p, w1h, w2, w3)

    try:
        h_seq_p, c_fin_p = run(True)
    except Exception:
        # Installed Pallas rejected BlockSpec(pipeline_mode=...); fall back to
        # the default double-buffered weight specs (correctness identical).
        h_seq_p, c_fin_p = run(False)

    return h_seq_p[:, :B, :H], c_fin_p[:B, :H]


def lstm_cell_forward(input_tensor, h_cur, c_cur, params):
    """Pallas-backed equivalent of LSTMCell.forward (bias=False): one step."""
    h_seq, c_next = lstm_sequence_forward(input_tensor[None], h_cur, c_cur,
                                          params, out_dtype=h_cur.dtype)
    return h_seq[0], c_next


# ---------------------------------------------------------------------------
# Reference (pure JAX, mirrors the PyTorch module)
# ---------------------------------------------------------------------------
def _reference_step(x, h, c, w_fc1, w_fc2, w_W, hidden_dim):
    combined = jnp.concatenate([x, h], axis=1)
    a = jax.nn.relu(combined @ w_fc1.T)
    a = jax.nn.relu(a @ w_fc2.T)
    cc = jax.nn.relu(a @ w_W.T)
    cc_i, cc_f, cc_o, cc_g = jnp.split(cc, 4, axis=1)
    i = jax.nn.sigmoid(cc_i)
    f = jax.nn.sigmoid(cc_f)
    o = jax.nn.sigmoid(cc_o)
    g = jnp.tanh(cc_g)
    c_next = f * c + i * g
    h_next = o * jnp.tanh(c_next)
    return h_next, c_next


if __name__ == "__main__":
    B, input_dim, hidden_dim, T = 2, 16, 32, 8

    key = jax.random.PRNGKey(0)
    k_x, k_h, k_c, k_w1, k_w2, k_w3 = jax.random.split(key, 6)

    x_seq = jax.random.normal(k_x, (T, B, input_dim), dtype=jnp.float32)
    h0 = jax.random.normal(k_h, (B, hidden_dim), dtype=jnp.float32)
    c0 = jax.random.normal(k_c, (B, hidden_dim), dtype=jnp.float32)

    # PyTorch nn.Linear (out, in) shaped weights, bias=False.
    w_fc1 = 0.1 * jax.random.normal(k_w1, (hidden_dim, input_dim + hidden_dim),
                                    dtype=jnp.float32)
    w_fc2 = 0.1 * jax.random.normal(k_w2, (hidden_dim, hidden_dim),
                                    dtype=jnp.float32)
    w_W = 0.1 * jax.random.normal(k_w3, (4 * hidden_dim, hidden_dim),
                                  dtype=jnp.float32)

    # One-time layout conversion (no per-call .T / concat).
    params_f32 = prepare_params(w_fc1, w_fc2, w_W, input_dim, hidden_dim,
                                param_dtype=jnp.float32)

    # --- single step: exactly LSTMCell.forward ---
    h1, c1 = lstm_cell_forward(x_seq[0], h0, c0, params_f32)
    jax.block_until_ready((h1, c1))
    h1_ref, c1_ref = _reference_step(x_seq[0], h0, c0, w_fc1, w_fc2, w_W,
                                     hidden_dim)
    assert jnp.allclose(h1, h1_ref, atol=1e-4, rtol=1e-4)
    assert jnp.allclose(c1, c1_ref, atol=1e-4, rtol=1e-4)

    # --- fused T-step recurrence in one pallas_call (T-chunked) ---
    h_seq, c_T = lstm_sequence_forward(x_seq, h0, c0, params_f32)
    jax.block_until_ready((h_seq, c_T))
    h_r, c_r = h0, c0
    hs_ref = []
    for t in range(T):
        h_r, c_r = _reference_step(x_seq[t], h_r, c_r, w_fc1, w_fc2, w_W,
                                   hidden_dim)
        hs_ref.append(h_r)
    hs_ref = jnp.stack(hs_ref)
    assert jnp.allclose(h_seq, hs_ref, atol=1e-4, rtol=1e-4)
    assert jnp.allclose(c_T, c_r, atol=1e-4, rtol=1e-4)

    # --- bf16-weight path (f32 accumulation, f32 gate math) ---
    params_bf16 = prepare_params(w_fc1, w_fc2, w_W, input_dim, hidden_dim,
                                 param_dtype=jnp.bfloat16)
    h_seq_b, c_T_b = lstm_sequence_forward(x_seq, h0, c0, params_bf16)
    jax.block_until_ready((h_seq_b, c_T_b))
    assert bool(jnp.all(jnp.isfinite(h_seq_b))) and bool(jnp.all(jnp.isfinite(c_T_b)))
    assert jnp.allclose(h_seq_b, hs_ref, atol=1e-1, rtol=1e-1)

    print("KERNEL_OK")
</pallas_src>

<mosaic_0001>
module attributes {stable_mosaic.version = 11 : i64} {
  func.func @lstm_kernel(%arg0: i32, %arg1: i32, %arg2: memref<1x8x128xf32, #tpu.memory_space<vmem>>, %arg3: memref<8x128xf32, #tpu.memory_space<vmem>>, %arg4: memref<8x128xf32, #tpu.memory_space<vmem>>, %arg5: memref<128x128xf32, #tpu.memory_space<vmem>>, %arg6: memref<128x128xf32, #tpu.memory_space<vmem>>, %arg7: memref<128x512xf32, #tpu.memory_space<vmem>>, %arg8: memref<1x8x128xf32, #tpu.memory_space<vmem>>, %arg9: memref<8x128xf32, #tpu.memory_space<vmem>>, %arg10: memref<8x128xf32, #tpu.memory_space<vmem>>, %arg11: memref<8x128xf32, #tpu.memory_space<vmem>>) attributes {dimension_semantics = [#tpu.dimension_semantics<parallel>, #tpu.dimension_semantics<arbitrary>], iteration_bounds = array<i64: 1, 1>, scalar_prefetch = 0 : i64, scratch_operands = 2 : i64, tpu.core_type = #tpu.core_type<tc>, window_params = [{transform_indices = @transform_0, window_bounds = array<i64: 1, 8, 128>}, {transform_indices = @transform_1, window_bounds = array<i64: 8, 128>}, {transform_indices = @transform_2, window_bounds = array<i64: 8, 128>}, {pipeline_mode = #tpu.pipeline_mode<synchronous>, transform_indices = @transform_3, window_bounds = array<i64: 128, 128>}, {pipeline_mode = #tpu.pipeline_mode<synchronous>, transform_indices = @transform_4, window_bounds = array<i64: 128, 128>}, {pipeline_mode = #tpu.pipeline_mode<synchronous>, transform_indices = @transform_5, window_bounds = array<i64: 128, 512>}, {transform_indices = @transform_6, window_bounds = array<i64: 1, 8, 128>}, {transform_indices = @transform_7, window_bounds = array<i64: 8, 128>}]} {
    %c0_i32 = arith.constant 0 : i32
    %0 = arith.cmpi eq, %arg1, %c0_i32 : i32
    %1 = arith.extui %0 : i1 to i32
    %c0_i32_0 = arith.constant 0 : i32
    %2 = arith.cmpi ne, %1, %c0_i32_0 : i32
    scf.if %2 {
      %c0_36 = arith.constant 0 : index
      %c0_37 = arith.constant 0 : index
      %59 = vector.load %arg3[%c0_36, %c0_37] : memref<8x128xf32, #tpu.memory_space<vmem>>, vector<8x128xf32>
      %c0_38 = arith.constant 0 : index
      %c0_39 = arith.constant 0 : index
      %60 = vector.load %arg10[%c0_38, %c0_39] : memref<8x128xf32, #tpu.memory_space<vmem>>, vector<8x128xf32>
      tpu.vector_store %arg10[%c0_38, %c0_39], %59 {strides = array<i32>} : memref<8x128xf32, #tpu.memory_space<vmem>>, vector<8x128xf32>,
      %c0_40 = arith.constant 0 : index
      %c0_41 = arith.constant 0 : index
      %61 = vector.load %arg4[%c0_40, %c0_41] : memref<8x128xf32, #tpu.memory_space<vmem>>, vector<8x128xf32>
      %c0_42 = arith.constant 0 : index
      %c0_43 = arith.constant 0 : index
      %62 = vector.load %arg11[%c0_42, %c0_43] : memref<8x128xf32, #tpu.memory_space<vmem>>, vector<8x128xf32>
      tpu.vector_store %arg11[%c0_42, %c0_43], %61 {strides = array<i32>} : memref<8x128xf32, #tpu.memory_space<vmem>>, vector<8x128xf32>,
    } else {
    }
    %c0 = arith.constant 0 : index
    %c0_1 = arith.constant 0 : index
    %3 = vector.load %arg10[%c0, %c0_1] : memref<8x128xf32, #tpu.memory_space<vmem>>, vector<8x128xf32>
    %c0_2 = arith.constant 0 : index
    %c0_3 = arith.constant 0 : index
    %4 = vector.load %arg11[%c0_2, %c0_3] : memref<8x128xf32, #tpu.memory_space<vmem>>, vector<8x128xf32>
    %c0_4 = arith.constant 0 : index
    %c0_5 = arith.constant 0 : index
    %c0_6 = arith.constant 0 : index
    %5 = vector.load %arg2[%c0_4, %c0_5, %c0_6] : memref<1x8x128xf32, #tpu.memory_space<vmem>>, vector<1x8x128xf32>
    %6 = vector.shape_cast %5 : vector<1x8x128xf32> to vector<8x128xf32>
    %c0_7 = arith.constant 0 : index
    %c0_8 = arith.constant 0 : index
    %7 = vector.load %arg5[%c0_7, %c0_8] : memref<128x128xf32, #tpu.memory_space<vmem>>, vector<128x128xf32>
    %cst = arith.constant dense<0.000000e+00> : vector<8x128xf32>
    %8 = tpu.matmul %3, %7, %cst {dimension_numbers = #tpu.dot_dimension_numbers<[1], [0], [0], [1], [0, 0, 1, 1], [], []>} : vector<8x128xf32>, vector<128x128xf32>, vector<8x128xf32> -> vector<8x128xf32>
    %9 = arith.addf %6, %8 : vector<8x128xf32>
    %cst_9 = arith.constant 0.000000e+00 : f32
    %10 = vector.broadcast %cst_9 : f32 to vector<8x128xf32>
    %11 = arith.maximumf %9, %10 : vector<8x128xf32>
    %c0_10 = arith.constant 0 : index
    %c0_11 = arith.constant 0 : index
    %12 = vector.load %arg6[%c0_10, %c0_11] : memref<128x128xf32, #tpu.memory_space<vmem>>, vector<128x128xf32>
    %cst_12 = arith.constant dense<0.000000e+00> : vector<8x128xf32>
    %13 = tpu.matmul %11, %12, %cst_12 {dimension_numbers = #tpu.dot_dimension_numbers<[1], [0], [0], [1], [0, 0, 1, 1], [], []>} : vector<8x128xf32>, vector<128x128xf32>, vector<8x128xf32> -> vector<8x128xf32>
    %cst_13 = arith.constant 0.000000e+00 : f32
    %14 = vector.broadcast %cst_13 : f32 to vector<8x128xf32>
    %15 = arith.maximumf %13, %14 : vector<8x128xf32>
    %c0_14 = arith.constant 0 : index
    %c0_15 = arith.constant 0 : index
    %16 = vector.load %arg7[%c0_14, %c0_15] : memref<128x512xf32, #tpu.memory_space<vmem>>, vector<128x512xf32>
    %cst_16 = arith.constant dense<0.000000e+00> : vector<8x512xf32>
    %17 = tpu.matmul %15, %16, %cst_16 {dimension_numbers = #tpu.dot_dimension_numbers<[1], [0], [0], [1], [0, 0, 1, 1], [], []>} : vector<8x128xf32>, vector<128x512xf32>, vector<8x512xf32> -> vector<8x512xf32>
    %cst_17 = arith.constant 0.000000e+00 : f32
    %18 = vector.broadcast %cst_17 : f32 to vector<8x512xf32>
    %19 = arith.maximumf %17, %18 : vector<8x512xf32>
    %20 = vector.extract_strided_slice %19 {offsets = [0, 0], sizes = [8, 128], strides = [1, 1]} : vector<8x512xf32> to vector<8x128xf32>
    %cst_18 = arith.constant 5.000000e-01 : f32
    %21 = vector.broadcast %cst_18 : f32 to vector<8x128xf32>
    %22 = arith.mulf %21, %20 : vector<8x128xf32>
    %23 = math.tanh %22 : vector<8x128xf32>
    %cst_19 = arith.constant 1.000000e+00 : f32
    %24 = vector.broadcast %cst_19 : f32 to vector<8x128xf32>
    %25 = arith.addf %23, %24 : vector<8x128xf32>
    %cst_20 = arith.constant 5.000000e-01 : f32
    %26 = vector.broadcast %cst_20 : f32 to vector<8x128xf32>
    %27 = arith.mulf %26, %25 : vector<8x128xf32>
    %28 = vector.extract_strided_slice %19 {offsets = [0, 128], sizes = [8, 128], strides = [1, 1]} : vector<8x512xf32> to vector<8x128xf32>
    %cst_21 = arith.constant 5.000000e-01 : f32
    %29 = vector.broadcast %cst_21 : f32 to vector<8x128xf32>
    %30 = arith.mulf %29, %28 : vector<8x128xf32>
    %31 = math.tanh %30 : vector<8x128xf32>
    %cst_22 = arith.constant 1.000000e+00 : f32
    %32 = vector.broadcast %cst_22 : f32 to vector<8x128xf32>
    %33 = arith.addf %31, %32 : vector<8x128xf32>
    %cst_23 = arith.constant 5.000000e-01 : f32
    %34 = vector.broadcast %cst_23 : f32 to vector<8x128xf32>
    %35 = arith.mulf %34, %33 : vector<8x128xf32>
    %36 = vector.extract_strided_slice %19 {offsets = [0, 256], sizes = [8, 128], strides = [1, 1]} : vector<8x512xf32> to vector<8x128xf32>
    %cst_24 = arith.constant 5.000000e-01 : f32
    %37 = vector.broadcast %cst_24 : f32 to vector<8x128xf32>
    %38 = arith.mulf %37, %36 : vector<8x128xf32>
    %39 = math.tanh %38 : vector<8x128xf32>
    %cst_25 = arith.constant 1.000000e+00 : f32
    %40 = vector.broadcast %cst_25 : f32 to vector<8x128xf32>
    %41 = arith.addf %39, %40 : vector<8x128xf32>
    %cst_26 = arith.constant 5.000000e-01 : f32
    %42 = vector.broadcast %cst_26 : f32 to vector<8x128xf32>
    %43 = arith.mulf %42, %41 : vector<8x128xf32>
    %44 = vector.extract_strided_slice %19 {offsets = [0, 384], sizes = [8, 128], strides = [1, 1]} : vector<8x512xf32> to vector<8x128xf32>
    %45 = math.tanh %44 : vector<8x128xf32>
    %46 = arith.mulf %35, %4 : vector<8x128xf32>
    %47 = arith.mulf %27, %45 : vector<8x128xf32>
    %48 = arith.addf %46, %47 : vector<8x128xf32>
    %49 = math.tanh %48 : vector<8x128xf32>
    %50 = arith.mulf %43, %49 : vector<8x128xf32>
    %c0_27 = arith.constant 0 : index
    %c0_28 = arith.constant 0 : index
    %c0_29 = arith.constant 0 : index
    %51 = vector.load %arg8[%c0_27, %c0_28, %c0_29] : memref<1x8x128xf32, #tpu.memory_space<vmem>>, vector<1x8x128xf32>
    %52 = vector.shape_cast %51 : vector<1x8x128xf32> to vector<8x128xf32>
    %53 = vector.shape_cast %50 : vector<8x128xf32> to vector<1x8x128xf32>
    tpu.vector_store %arg8[%c0_27, %c0_28, %c0_29], %53 {strides = array<i32>} : memref<1x8x128xf32, #tpu.memory_space<vmem>>, vector<1x8x128xf32>,
    %c0_30 = arith.constant 0 : index
    %c0_31 = arith.constant 0 : index
    %54 = vector.load %arg10[%c0_30, %c0_31] : memref<8x128xf32, #tpu.memory_space<vmem>>, vector<8x128xf32>
    tpu.vector_store %arg10[%c0_30, %c0_31], %50 {strides = array<i32>} : memref<8x128xf32, #tpu.memory_space<vmem>>, vector<8x128xf32>,
    %c0_32 = arith.constant 0 : index
    %c0_33 = arith.constant 0 : index
    %55 = vector.load %arg11[%c0_32, %c0_33] : memref<8x128xf32, #tpu.memory_space<vmem>>, vector<8x128xf32>
    tpu.vector_store %arg11[%c0_32, %c0_33], %48 {strides = array<i32>} : memref<8x128xf32, #tpu.memory_space<vmem>>, vector<8x128xf32>,
    %c0_i32_34 = arith.constant 0 : i32
    %56 = arith.cmpi eq, %arg1, %c0_i32_34 : i32
    %57 = arith.extui %56 : i1 to i32
    %c0_i32_35 = arith.constant 0 : i32
    %58 = arith.cmpi ne, %57, %c0_i32_35 : i32
    scf.if %58 {
      %c0_36 = arith.constant 0 : index
      %c0_37 = arith.constant 0 : index
      %59 = vector.load %arg9[%c0_36, %c0_37] : memref<8x128xf32, #tpu.memory_space<vmem>>, vector<8x128xf32>
      tpu.vector_store %arg9[%c0_36, %c0_37], %48 {strides = array<i32>} : memref<8x128xf32, #tpu.memory_space<vmem>>, vector<8x128xf32>,
    } else {
    }
    return
  }
  func.func @transform_0(%arg0: i32, %arg1: i32) -> (i32, i32, i32) {
    %c0_i32 = arith.constant 0 : i32
    %c0_i32_0 = arith.constant 0 : i32
    return %arg1, %arg0, %c0_i32 : i32, i32, i32
  }
  func.func @transform_1(%arg0: i32, %arg1: i32) -> (i32, i32) {
    %c0_i32 = arith.constant 0 : i32
    %c0_i32_0 = arith.constant 0 : i32
    return %arg0, %c0_i32 : i32, i32
  }
  func.func @transform_2(%arg0: i32, %arg1: i32) -> (i32, i32) {
    %c0_i32 = arith.constant 0 : i32
    %c0_i32_0 = arith.constant 0 : i32
    return %arg0, %c0_i32 : i32, i32
  }
  func.func @transform_3(%arg0: i32, %arg1: i32) -> (i32, i32) {
    %c0_i32 = arith.constant 0 : i32
    %c0_i32_0 = arith.constant 0 : i32
    %c0_i32_1 = arith.constant 0 : i32
    return %c0_i32, %c0_i32_0 : i32, i32
  }
  func.func @transform_4(%arg0: i32, %arg1: i32) -> (i32, i32) {
    %c0_i32 = arith.constant 0 : i32
    %c0_i32_0 = arith.constant 0 : i32
    %c0_i32_1 = arith.constant 0 : i32
    return %c0_i32, %c0_i32_0 : i32, i32
  }
  func.func @transform_5(%arg0: i32, %arg1: i32) -> (i32, i32) {
    %c0_i32 = arith.constant 0 : i32
    %c0_i32_0 = arith.constant 0 : i32
    %c0_i32_1 = arith.constant 0 : i32
    return %c0_i32, %c0_i32_0 : i32, i32
  }
  func.func @transform_6(%arg0: i32, %arg1: i32) -> (i32, i32, i32) {
    %c0_i32 = arith.constant 0 : i32
    %c0_i32_0 = arith.constant 0 : i32
    return %arg1, %arg0, %c0_i32 : i32, i32, i32
  }
  func.func @transform_7(%arg0: i32, %arg1: i32) -> (i32, i32) {
    %c0_i32 = arith.constant 0 : i32
    %c0_i32_0 = arith.constant 0 : i32
    return %arg0, %c0_i32 : i32, i32
  }
}

module attributes {stable_mosaic.version = 11 : i64} {
  func.func @lstm_kernel(%arg0: i32, %arg1: i32, %arg2: memref<1x8x128xf32, #tpu.memory_space<vmem>>, %arg3: memref<8x128xf32, #tpu.memory_space<vmem>>, %arg4: memref<8x128xf32, #tpu.memory_space<vmem>>, %arg5: memref<128x128xf32, #tpu.memory_space<vmem>>, %arg6: memref<128x128xf32, #tpu.memory_space<vmem>>, %arg7: memref<128x512xf32, #tpu.memory_space<vmem>>, %arg8: memref<1x8x128xf32, #tpu.memory_space<vmem>>, %arg9: memref<8x128xf32, #tpu.memory_space<vmem>>, %arg10: memref<8x128xf32, #tpu.memory_space<vmem>>, %arg11: memref<8x128xf32, #tpu.memory_space<vmem>>) attributes {dimension_semantics = [#tpu.dimension_semantics<parallel>, #tpu.dimension_semantics<arbitrary>], iteration_bounds = array<i64: 1, 1>, scalar_prefetch = 0 : i64, scratch_operands = 2 : i64, tpu.core_type = #tpu.core_type<tc>, window_params = [{transform_indices = @transform_0, window_bounds = array<i64: 1, 8, 128>}, {transform_indices = @transform_1, window_bounds = array<i64: 8, 128>}, {transform_indices = @transform_2, window_bounds = array<i64: 8, 128>}, {pipeline_mode = #tpu.pipeline_mode<synchronous>, transform_indices = @transform_3, window_bounds = array<i64: 128, 128>}, {pipeline_mode = #tpu.pipeline_mode<synchronous>, transform_indices = @transform_4, window_bounds = array<i64: 128, 128>}, {pipeline_mode = #tpu.pipeline_mode<synchronous>, transform_indices = @transform_5, window_bounds = array<i64: 128, 512>}, {transform_indices = @transform_6, window_bounds = array<i64: 1, 8, 128>}, {transform_indices = @transform_7, window_bounds = array<i64: 8, 128>}]} {
    %c0_i32 = arith.constant 0 : i32
    %0 = arith.cmpi eq, %arg1, %c0_i32 : i32
    %1 = arith.extui %0 : i1 to i32
    %c0_i32_0 = arith.constant 0 : i32
    %2 = arith.cmpi ne, %1, %c0_i32_0 : i32
    scf.if %2 {
      %c0_36 = arith.constant 0 : index
      %c0_37 = arith.constant 0 : index
      %59 = vector.load %arg3[%c0_36, %c0_37] : memref<8x128xf32, #tpu.memory_space<vmem>>, vector<8x128xf32>
      %c0_38 = arith.constant 0 : index
      %c0_39 = arith.constant 0 : index
      %60 = vector.load %arg10[%c0_38, %c0_39] : memref<8x128xf32, #tpu.memory_space<vmem>>, vector<8x128xf32>
      tpu.vector_store %arg10[%c0_38, %c0_39], %59 {strides = array<i32>} : memref<8x128xf32, #tpu.memory_space<vmem>>, vector<8x128xf32>,
      %c0_40 = arith.constant 0 : index
      %c0_41 = arith.constant 0 : index
      %61 = vector.load %arg4[%c0_40, %c0_41] : memref<8x128xf32, #tpu.memory_space<vmem>>, vector<8x128xf32>
      %c0_42 = arith.constant 0 : index
      %c0_43 = arith.constant 0 : index
      %62 = vector.load %arg11[%c0_42, %c0_43] : memref<8x128xf32, #tpu.memory_space<vmem>>, vector<8x128xf32>
      tpu.vector_store %arg11[%c0_42, %c0_43], %61 {strides = array<i32>} : memref<8x128xf32, #tpu.memory_space<vmem>>, vector<8x128xf32>,
    } else {
    }
    %c0 = arith.constant 0 : index
    %c0_1 = arith.constant 0 : index
    %3 = vector.load %arg10[%c0, %c0_1] : memref<8x128xf32, #tpu.memory_space<vmem>>, vector<8x128xf32>
    %c0_2 = arith.constant 0 : index
    %c0_3 = arith.constant 0 : index
    %4 = vector.load %arg11[%c0_2, %c0_3] : memref<8x128xf32, #tpu.memory_space<vmem>>, vector<8x128xf32>
    %c0_4 = arith.constant 0 : index
    %c0_5 = arith.constant 0 : index
    %c0_6 = arith.constant 0 : index
    %5 = vector.load %arg2[%c0_4, %c0_5, %c0_6] : memref<1x8x128xf32, #tpu.memory_space<vmem>>, vector<1x8x128xf32>
    %6 = vector.shape_cast %5 : vector<1x8x128xf32> to vector<8x128xf32>
    %c0_7 = arith.constant 0 : index
    %c0_8 = arith.constant 0 : index
    %7 = vector.load %arg5[%c0_7, %c0_8] : memref<128x128xf32, #tpu.memory_space<vmem>>, vector<128x128xf32>
    %cst = arith.constant dense<0.000000e+00> : vector<8x128xf32>
    %8 = tpu.matmul %3, %7, %cst {dimension_numbers = #tpu.dot_dimension_numbers<[1], [0], [0], [1], [0, 0, 1, 1], [], []>} : vector<8x128xf32>, vector<128x128xf32>, vector<8x128xf32> -> vector<8x128xf32>
    %9 = arith.addf %6, %8 : vector<8x128xf32>
    %cst_9 = arith.constant 0.000000e+00 : f32
    %10 = vector.broadcast %cst_9 : f32 to vector<8x128xf32>
    %11 = arith.maximumf %9, %10 : vector<8x128xf32>
    %c0_10 = arith.constant 0 : index
    %c0_11 = arith.constant 0 : index
    %12 = vector.load %arg6[%c0_10, %c0_11] : memref<128x128xf32, #tpu.memory_space<vmem>>, vector<128x128xf32>
    %cst_12 = arith.constant dense<0.000000e+00> : vector<8x128xf32>
    %13 = tpu.matmul %11, %12, %cst_12 {dimension_numbers = #tpu.dot_dimension_numbers<[1], [0], [0], [1], [0, 0, 1, 1], [], []>} : vector<8x128xf32>, vector<128x128xf32>, vector<8x128xf32> -> vector<8x128xf32>
    %cst_13 = arith.constant 0.000000e+00 : f32
    %14 = vector.broadcast %cst_13 : f32 to vector<8x128xf32>
    %15 = arith.maximumf %13, %14 : vector<8x128xf32>
    %c0_14 = arith.constant 0 : index
    %c0_15 = arith.constant 0 : index
    %16 = vector.load %arg7[%c0_14, %c0_15] : memref<128x512xf32, #tpu.memory_space<vmem>>, vector<128x512xf32>
    %cst_16 = arith.constant dense<0.000000e+00> : vector<8x512xf32>
    %17 = tpu.matmul %15, %16, %cst_16 {dimension_numbers = #tpu.dot_dimension_numbers<[1], [0], [0], [1], [0, 0, 1, 1], [], []>} : vector<8x128xf32>, vector<128x512xf32>, vector<8x512xf32> -> vector<8x512xf32>
    %cst_17 = arith.constant 0.000000e+00 : f32
    %18 = vector.broadcast %cst_17 : f32 to vector<8x512xf32>
    %19 = arith.maximumf %17, %18 : vector<8x512xf32>
    %20 = vector.extract_strided_slice %19 {offsets = [0, 0], sizes = [8, 128], strides = [1, 1]} : vector<8x512xf32> to vector<8x128xf32>
    %cst_18 = arith.constant 5.000000e-01 : f32
    %21 = vector.broadcast %cst_18 : f32 to vector<8x128xf32>
    %22 = arith.mulf %21, %20 : vector<8x128xf32>
    %23 = math.tanh %22 : vector<8x128xf32>
    %cst_19 = arith.constant 1.000000e+00 : f32
    %24 = vector.broadcast %cst_19 : f32 to vector<8x128xf32>
    %25 = arith.addf %23, %24 : vector<8x128xf32>
    %cst_20 = arith.constant 5.000000e-01 : f32
    %26 = vector.broadcast %cst_20 : f32 to vector<8x128xf32>
    %27 = arith.mulf %26, %25 : vector<8x128xf32>
    %28 = vector.extract_strided_slice %19 {offsets = [0, 128], sizes = [8, 128], strides = [1, 1]} : vector<8x512xf32> to vector<8x128xf32>
    %cst_21 = arith.constant 5.000000e-01 : f32
    %29 = vector.broadcast %cst_21 : f32 to vector<8x128xf32>
    %30 = arith.mulf %29, %28 : vector<8x128xf32>
    %31 = math.tanh %30 : vector<8x128xf32>
    %cst_22 = arith.constant 1.000000e+00 : f32
    %32 = vector.broadcast %cst_22 : f32 to vector<8x128xf32>
    %33 = arith.addf %31, %32 : vector<8x128xf32>
    %cst_23 = arith.constant 5.000000e-01 : f32
    %34 = vector.broadcast %cst_23 : f32 to vector<8x128xf32>
    %35 = arith.mulf %34, %33 : vector<8x128xf32>
    %36 = vector.extract_strided_slice %19 {offsets = [0, 256], sizes = [8, 128], strides = [1, 1]} : vector<8x512xf32> to vector<8x128xf32>
    %cst_24 = arith.constant 5.000000e-01 : f32
    %37 = vector.broadcast %cst_24 : f32 to vector<8x128xf32>
    %38 = arith.mulf %37, %36 : vector<8x128xf32>
    %39 = math.tanh %38 : vector<8x128xf32>
    %cst_25 = arith.constant 1.000000e+00 : f32
    %40 = vector.broadcast %cst_25 : f32 to vector<8x128xf32>
    %41 = arith.addf %39, %40 : vector<8x128xf32>
    %cst_26 = arith.constant 5.000000e-01 : f32
    %42 = vector.broadcast %cst_26 : f32 to vector<8x128xf32>
    %43 = arith.mulf %42, %41 : vector<8x128xf32>
    %44 = vector.extract_strided_slice %19 {offsets = [0, 384], sizes = [8, 128], strides = [1, 1]} : vector<8x512xf32> to vector<8x128xf32>
    %45 = math.tanh %44 : vector<8x128xf32>
    %46 = arith.mulf %35, %4 : vector<8x128xf32>
    %47 = arith.mulf %27, %45 : vector<8x128xf32>
    %48 = arith.addf %46, %47 : vector<8x128xf32>
    %49 = math.tanh %48 : vector<8x128xf32>
    %50 = arith.mulf %43, %49 : vector<8x128xf32>
    %c0_27 = arith.constant 0 : index
    %c0_28 = arith.constant 0 : index
    %c0_29 = arith.constant 0 : index
    %51 = vector.load %arg8[%c0_27, %c0_28, %c0_29] : memref<1x8x128xf32, #tpu.memory_space<vmem>>, vector<1x8x128xf32>
    %52 = vector.shape_cast %51 : vector<1x8x128xf32> to vector<8x128xf32>
    %53 = vector.shape_cast %50 : vector<8x128xf32> to vector<1x8x128xf32>
    tpu.vector_store %arg8[%c0_27, %c0_28, %c0_29], %53 {strides = array<i32>} : memref<1x8x128xf32, #tpu.memory_space<vmem>>, vector<1x8x128xf32>,
    %c0_30 = arith.constant 0 : index
    %c0_31 = arith.constant 0 : index
    %54 = vector.load %arg10[%c0_30, %c0_31] : memref<8x128xf32, #tpu.memory_space<vmem>>, vector<8x128xf32>
    tpu.vector_store %arg10[%c0_30, %c0_31], %50 {strides = array<i32>} : memref<8x128xf32, #tpu.memory_space<vmem>>, vector<8x128xf32>,
    %c0_32 = arith.constant 0 : index
    %c0_33 = arith.constant 0 : index
    %55 = vector.load %arg11[%c0_32, %c0_33] : memref<8x128xf32, #tpu.memory_space<vmem>>, vector<8x128xf32>
    tpu.vector_store %arg11[%c0_32, %c0_33], %48 {strides = array<i32>} : memref<8x128xf32, #tpu.memory_space<vmem>>, vector<8x128xf32>,
    %c0_i32_34 = arith.constant 0 : i32
    %56 = arith.cmpi eq, %arg1, %c0_i32_34 : i32
    %57 = arith.extui %56 : i1 to i32
    %c0_i32_35 = arith.constant 0 : i32
    %58 = arith.cmpi ne, %57, %c0_i32_35 : i32
    scf.if %58 {
      %c0_36 = arith.constant 0 : index
      %c0_37 = arith.constant 0 : index
      %59 = vector.load %arg9[%c0_36, %c0_37] : memref<8x128xf32, #tpu.memory_space<vmem>>, vector<8x128xf32>
      tpu.vector_store %arg9[%c0_36, %c0_37], %48 {strides = array<i32>} : memref<8x128xf32, #tpu.memory_space<vmem>>, vector<8x128xf32>,
    } else {
    }
    return
  }
  func.func @transform_0(%arg0: i32, %arg1: i32) -> (i32, i32, i32) {
    %c0_i32 = arith.constant 0 : i32
    %c0_i32_0 = arith.constant 0 : i32
    return %arg1, %arg0, %c0_i32 : i32, i32, i32
  }
  func.func @transform_1(%arg0: i32, %arg1: i32) -> (i32, i32) {
    %c0_i32 = arith.constant 0 : i32
    %c0_i32_0 = arith.constant 0 : i32
    return %arg0, %c0_i32 : i32, i32
  }
  func.func @transform_2(%arg0: i32, %arg1: i32) -> (i32, i32) {
    %c0_i32 = arith.constant 0 : i32
    %c0_i32_0 = arith.constant 0 : i32
    return %arg0, %c0_i32 : i32, i32
  }
  func.func @transform_3(%arg0: i32, %arg1: i32) -> (i32, i32) {
    %c0_i32 = arith.constant 0 : i32
    %c0_i32_0 = arith.constant 0 : i32
    %c0_i32_1 = arith.constant 0 : i32
    return %c0_i32, %c0_i32_0 : i32, i32
  }
  func.func @transform_4(%arg0: i32, %arg1: i32) -> (i32, i32) {
    %c0_i32 = arith.constant 0 : i32
    %c0_i32_0 = arith.constant 0 : i32
    %c0_i32_1 = arith.constant 0 : i32
    return %c0_i32, %c0_i32_0 : i32, i32
  }
  func.func @transform_5(%arg0: i32, %arg1: i32) -> (i32, i32) {
    %c0_i32 = arith.constant 0 : i32
    %c0_i32_0 = arith.constant 0 : i32
    %c0_i32_1 = arith.constant 0 : i32
    return %c0_i32, %c0_i32_0 : i32, i32
  }
  func.func @transform_6(%arg0: i32, %arg1: i32) -> (i32, i32, i32) {
    %c0_i32 = arith.constant 0 : i32
    %c0_i32_0 = arith.constant 0 : i32
    return %arg1, %arg0, %c0_i32 : i32, i32, i32
  }
  func.func @transform_7(%arg0: i32, %arg1: i32) -> (i32, i32) {
    %c0_i32 = arith.constant 0 : i32
    %c0_i32_0 = arith.constant 0 : i32
    return %arg0, %c0_i32 : i32, i32
  }
}

</mosaic_0001>

<bundles_post_ra>
// kernel: tpu_custom_call.1
= control target key start
LH: loop header
LB: loop body
LE: loop exit
PB: predicated region body
PF: predicated region fallthrough
CT: control target
= control target key end

     0   :  { %13 = vsyncpa [#allocation5], 0  ;;  %s976_s0 = inlined_call_operand.hbm [shape: f32[1,8,128], index: 0, kind: input, shape index: {}]   ;;  %s977_s1 = inlined_call_operand.hbm [shape: f32[8,128], index: 1, kind: input, shape index: {}]   ;;  %s978_s2 = inlined_call_operand.hbm [shape: f32[8,128], index: 2, kind: input, shape index: {}]   ;;  %s979_s3 = inlined_call_operand.hbm [shape: f32[128,128], index: 3, kind: input, shape index: {}]   ;;  %s980_s4 = inlined_call_operand.hbm [shape: f32[128,128], index: 4, kind: input, shape index: {}]   ;;  %s981_s5 = inlined_call_operand.hbm [shape: f32[128,512], index: 5, kind: input, shape index: {}]   ;;  %s982_s6 = inlined_call_operand.hbm [shape: f32[1,8,128], index: 6, kind: output, shape index: {0}]   ;;  %s983_s7 = inlined_call_operand.hbm [shape: f32[8,128], index: 7, kind: output, shape index: {1}]  }
   0x1   :  { %14 = vsyncpa [#allocation8], 0 }
   0x2   :  { %15 = vsyncpa [#allocation11], 0 }
   0x3   :  { %16 = vsyncpa [#allocation14], 0 }
   0x4   :  { %17 = vsyncpa [#allocation6], 0 }
   0x5   :  { %18 = vsyncpa [#allocation17], 0  ;;  %s856_s24 = smov [#allocation7]   ;;  %s857_s26 = smov [#allocation10]  }
   0x6   :  { %s35_s25 = sshll.u32 %s856_s24, 4  ;;  %s54_s27 = sshll.u32 %s857_s26, 4  ;;  %s36_s25 = int_to_ptr.vmem [resolvable:$true] %s35_s25  ;;  %s55_s27 = int_to_ptr.vmem [resolvable:$true] %s54_s27 }
   0x7   :  { %s692_s28 = scalar_lea.vmem %s36_s25, 128  ;;  %p697_p1 = scmp.lt.s32.totalorder %s36_s25, %s36_s25 }
   0x8   :  { %p693_p0 = scmp.ne.s32.totalorder %s36_s25, %s692_s28  ;;  %p698_p2 = scmp.lt.s32.totalorder %s692_s28, %s692_s28 }
   0xa   :  { %p699_p3 = por %p698_p2, %p697_p1 }
   0xc   :  { %p700_p4 = pnand %p699_p3, %p693_p0 }
   0xe   :  { %703 = shalt.err (!%p700_p4)
}
   0xf   :  { %38 = dma.hbm_to_vmem [thread:$0]  %s977_s1, 128, %s36_s25, [#allocation8]  }
  0x10   :  { %s712_s8 = scalar_lea.vmem %s55_s27, 2048  ;;  %p717_p6 = scmp.lt.s32.totalorder %s55_s27, %s55_s27 }
  0x11   :  { %p713_p5 = scmp.ne.s32.totalorder %s55_s27, %s712_s8  ;;  %p718_p7 = scmp.lt.s32.totalorder %s712_s8, %s712_s8 }
  0x13   :  { %p719_p8 = por %p718_p7, %p717_p6 }
  0x15   :  { %p720_p9 = pnand %p719_p8, %p713_p5 }
  0x17   :  { %723 = shalt.err (!%p720_p9)
}
  0x18   :  { %s858_s9 = smov 128   ;;  %s859_s10 = smov 8  }
  0x19   :  { %60 = dma.hbm_to_vmem [thread:$0]  %s979_s3, 2048, %s55_s27, [#allocation11], %s858_s9, %s858_s9, %s859_s10  }
  0x1a   :  { %s860_s13 = smov [#allocation4]   ;;  %s861_s15 = smov [#allocation9]  }
  0x1b   :  { %s25_s14 = sshll.u32 %s860_s13, 4  ;;  %s45_s1 = sshll.u32 %s861_s15, 4  ;;  %s26_s14 = int_to_ptr.vmem [resolvable:$true] %s25_s14  ;;  %s46_s1 = int_to_ptr.vmem [resolvable:$true] %s45_s1 }
  0x1c   :  { %s732_s16 = scalar_lea.vmem %s26_s14, 128  ;;  %p737_p11 = scmp.lt.s32.totalorder %s26_s14, %s26_s14 }
  0x1d   :  { %p733_p10 = scmp.ne.s32.totalorder %s26_s14, %s732_s16  ;;  %p738_p12 = scmp.lt.s32.totalorder %s732_s16, %s732_s16 }
  0x1f   :  { %p739_p13 = por %p738_p12, %p737_p11 }
  0x21   :  { %p740_p0 = pnand %p739_p13, %p733_p10 }
  0x23   :  { %743 = shalt.err (!%p740_p0)
}
  0x24   :  { %28 = dma.hbm_to_vmem [thread:$0]  %s976_s0, 128, %s26_s14, [#allocation5]  }
  0x25   :  { %s752_s19 = scalar_lea.vmem %s46_s1, 128  ;;  %p757_p2 = scmp.lt.s32.totalorder %s46_s1, %s46_s1 }
  0x26   :  { %p753_p1 = scmp.ne.s32.totalorder %s46_s1, %s752_s19  ;;  %p758_p3 = scmp.lt.s32.totalorder %s752_s19, %s752_s19 }
  0x28   :  { %p759_p4 = por %p758_p3, %p757_p2 }
  0x2a   :  { %p760_p5 = pnand %p759_p4, %p753_p1 }
  0x2c   :  { %763 = shalt.err (!%p760_p5)
}
  0x2d   :  { %48 = dma.hbm_to_vmem [thread:$0]  %s978_s2, 128, %s46_s1, [#allocation8]  }
  0x2e   :  { %s862_s21 = smov [#allocation12]   ;;  %s863_s23 = smov [#allocation13]  }
  0x2f   :  { %s66_s22 = sshll.u32 %s862_s21, 4  ;;  %s78_s24 = sshll.u32 %s863_s23, 4  ;;  %s67_s22 = int_to_ptr.vmem [resolvable:$true] %s66_s22  ;;  %s79_s24 = int_to_ptr.vmem [resolvable:$true] %s78_s24 }
  0x30   :  { %s772_s25 = scalar_lea.vmem %s67_s22, 2048  ;;  %p777_p7 = scmp.lt.s32.totalorder %s67_s22, %s67_s22 }
  0x31   :  { %p773_p6 = scmp.ne.s32.totalorder %s67_s22, %s772_s25  ;;  %p778_p8 = scmp.lt.s32.totalorder %s772_s25, %s772_s25 }
  0x33   :  { %p779_p9 = por %p778_p8, %p777_p7 }
  0x35   :  { %p780_p10 = pnand %p779_p9, %p773_p6 }
  0x37   :  { %783 = shalt.err (!%p780_p10)
}
  0x38   :  { %72 = dma.hbm_to_vmem [thread:$0]  %s980_s4, 2048, %s67_s22, [#allocation11], %s858_s9, %s858_s9, %s859_s10  }
  0x39   :  { %s792_s2 = scalar_lea.vmem %s79_s24, 8192  ;;  %p797_p12 = scmp.lt.s32.totalorder %s79_s24, %s79_s24 }
  0x3a   :  { %p793_p11 = scmp.ne.s32.totalorder %s79_s24, %s792_s2  ;;  %p798_p13 = scmp.lt.s32.totalorder %s792_s2, %s792_s2 }
  0x3c   :  { %p799_p0 = por %p798_p13, %p797_p12 }
  0x3e   :  { %p800_p1 = pnand %p799_p0, %p793_p11 }
  0x40   :  { %803 = shalt.err (!%p800_p1)
}
  0x41   :  { %s864_s27 = smov 512   ;;  %s865_s28 = smov 32  }
  0x42   :  { %84 = dma.hbm_to_vmem [thread:$0]  %s981_s5, 8192, %s79_s24, [#allocation14], %s864_s27, %s864_s27, %s865_s28  }
  0x43   :  { %844 = dma.done.wait [#allocation5], 128  }
  0x44   :  { %845 = vsyncadd [#allocation5], 4294967168 }
  0x45   :  { %846 = dma.done.wait [#allocation8], 256  }
  0x46   :  { %847 = vsyncadd [#allocation8], 4294967040 }
  0x47   :  { %848 = dma.done.wait [#allocation11], 4096  }
  0x48   :  { %849 = vsyncadd [#allocation11], 4294963200 }
  0x49   :  { %850 = dma.done.wait [#allocation14], 8192  }
  0x4a   :  { %851 = vsyncadd [#allocation14], 4294959104  ;;  %v866_v0 = vmov 0.0   ;;  %vm867_vm0 = vmmov 0   ;;  %v129_v1 = vld [vmem:[#allocation10 + $0x78] sm:$0xff]  ;;  %v128_v2 = vld [vmem:[#allocation10 + $0x70] sm:$0xff] }
  0x4b   :  { %590 = vmatprep.subr.mxu0 %v866_v0  ;;  %622 = vmatprep.mubr.msk.f32.mxu0 %vm867_vm0, %v866_v0  ;;  %v127_v3 = vld [vmem:[#allocation10 + $0x68] sm:$0xff]  ;;  %v126_v4 = vld [vmem:[#allocation10 + $0x60] sm:$0xff]  ;;  %v217_v5 = vld [vmem:[#allocation12 + $0x78] sm:$0xff]  ;;  %s868_s4 = smov [#allocation16]  }
  0x4c   :  { %625 = vmatprep.subr.mxu1 %v866_v0  ;;  %657 = vmatprep.mubr.msk.f32.mxu1 %vm867_vm0, %v866_v0  ;;  %v125_v6 = vld [vmem:[#allocation10 + $0x58] sm:$0xff]  ;;  %v216_v7 = vld [vmem:[#allocation12 + $0x70] sm:$0xff]  ;;  %v215_v8 = vld [vmem:[#allocation12 + $0x68] sm:$0xff]  ;;  %s540_s5 = sshll.u32 %s868_s4, 4  ;;  %s541_s5 = int_to_ptr.vmem [resolvable:$true] %s540_s5 }
  0x4d   :  { %591 = vmatpush3.msra.mxu0 %v129_v1  ;;  %626 = vmatpush3.msra.mxu1 %v217_v5  ;;  %v124_v9 = vld [vmem:[#allocation10 + $0x50] sm:$0xff]  ;;  %v214_v10 = vld [vmem:[#allocation12 + $0x60] sm:$0xff]  ;;  %v123_v11 = vld [vmem:[#allocation10 + $0x48] sm:$0xff]  ;;  %s804_s8 = scalar_lea.vmem %s541_s5, 128  ;;  %p809_p3 = scmp.lt.s32.totalorder %s541_s5, %s541_s5 }
  0x4e   :  { %592 = vmatprep.subr.mxu0 %v866_v0  ;;  %627 = vmatprep.subr.mxu1 %v866_v0  ;;  %v213_v12 = vld [vmem:[#allocation12 + $0x58] sm:$0xff]  ;;  %v122_v13 = vld [vmem:[#allocation10 + $0x40] sm:$0xff]  ;;  %v212_v14 = vld [vmem:[#allocation12 + $0x50] sm:$0xff]  ;;  %p805_p2 = scmp.ne.s32.totalorder %s541_s5, %s804_s8  ;;  %p810_p4 = scmp.lt.s32.totalorder %s804_s8, %s804_s8 }
  0x4f   :  { %593 = vmatpush3.msra.mxu0 %v128_v2  ;;  %628 = vmatpush3.msra.mxu1 %v216_v7  ;;  %v121_v15 = vld [vmem:[#allocation10 + $0x38] sm:$0xff]  ;;  %v211_v16 = vld [vmem:[#allocation12 + $0x48] sm:$0xff]  ;;  %v120_v17 = vld [vmem:[#allocation10 + $0x30] sm:$0xff] }
  0x50   :  { %594 = vmatprep.subr.mxu0 %v866_v0  ;;  %629 = vmatprep.subr.mxu1 %v866_v0  ;;  %v210_v18 = vld [vmem:[#allocation12 + $0x40] sm:$0xff]  ;;  %v119_v19 = vld [vmem:[#allocation10 + $0x28] sm:$0xff]  ;;  %v209_v20 = vld [vmem:[#allocation12 + $0x38] sm:$0xff]  ;;  %p811_p5 = por %p810_p4, %p809_p3 }
  0x51   :  { %595 = vmatpush3.msra.mxu0 %v127_v3  ;;  %630 = vmatpush3.msra.mxu1 %v215_v8  ;;  %v118_v21 = vld [vmem:[#allocation10 + $0x20] sm:$0xff]  ;;  %v208_v22 = vld [vmem:[#allocation12 + $0x30] sm:$0xff]  ;;  %v117_v23 = vld [vmem:[#allocation10 + $0x18] sm:$0xff] }
  0x52   :  { %596 = vmatprep.subr.mxu0 %v866_v0  ;;  %631 = vmatprep.subr.mxu1 %v866_v0  ;;  %v207_v24 = vld [vmem:[#allocation12 + $0x28] sm:$0xff]  ;;  %v116_v25 = vld [vmem:[#allocation10 + $0x10] sm:$0xff]  ;;  %v206_v26 = vld [vmem:[#allocation12 + $0x20] sm:$0xff]  ;;  %p812_p6 = pnand %p811_p5, %p805_p2 }
  0x53   :  { %597 = vmatpush3.msra.mxu0 %v126_v4  ;;  %632 = vmatpush3.msra.mxu1 %v214_v10  ;;  %v115_v27 = vld [vmem:[#allocation10 + $0x8] sm:$0xff]  ;;  %v205_v28 = vld [vmem:[#allocation12 + $0x18] sm:$0xff]  ;;  %v114_v29 = vld [vmem:[#allocation10] sm:$0xff] }
  0x54   :  { %598 = vmatprep.subr.mxu0 %v866_v0  ;;  %633 = vmatprep.subr.mxu1 %v866_v0  ;;  %v107_v30 = vld [vmem:[#allocation7] sm:$0xff]  ;;  %v203_v32 = vld [vmem:[#allocation12 + $0x8] sm:$0xff]  ;;  %v202_v33 = vld [vmem:[#allocation12] sm:$0xff] }
  0x55   :  { %599 = vmatpush3.msra.mxu0 %v125_v6  ;;  %634 = vmatpush3.msra.mxu1 %v213_v12  ;;  %v204_v31 = vld [vmem:[#allocation12 + $0x10] sm:$0xff]  ;;  %v350_v34 = vld [vmem:[#allocation13 + $0x1e8] sm:$0xff]  ;;  %v352_v35 = vld [vmem:[#allocation13 + $0x1f8] sm:$0xff] }
  0x56   :  { %600 = vmatprep.subr.mxu0 %v866_v0  ;;  %635 = vmatprep.subr.mxu1 %v866_v0  ;;  %v349_v36 = vld [vmem:[#allocation13 + $0x1e0] sm:$0xff]  ;;  %v346_v37 = vld [vmem:[#allocation13 + $0x1c8] sm:$0xff]  ;;  %v351_v6 = vld [vmem:[#allocation13 + $0x1f0] sm:$0xff] }
  0x57   :  { %601 = vmatpush3.msra.mxu0 %v124_v9  ;;  %636 = vmatpush3.msra.mxu1 %v212_v14  ;;  %v345_v38 = vld [vmem:[#allocation13 + $0x1c0] sm:$0xff]  ;;  %v342_v39 = vld [vmem:[#allocation13 + $0x1a8] sm:$0xff]  ;;  %v348_v7 = vld [vmem:[#allocation13 + $0x1d8] sm:$0xff] }
  0x58   :  { %602 = vmatprep.subr.mxu0 %v866_v0  ;;  %637 = vmatprep.subr.mxu1 %v866_v0  ;;  %v341_v40 = vld [vmem:[#allocation13 + $0x1a0] sm:$0xff]  ;;  %v338_v41 = vld [vmem:[#allocation13 + $0x188] sm:$0xff]  ;;  %v347_v8 = vld [vmem:[#allocation13 + $0x1d0] sm:$0xff] }
  0x59   :  { %603 = vmatpush3.msra.mxu0 %v123_v11  ;;  %638 = vmatpush3.msra.mxu1 %v211_v16  ;;  %v337_v42 = vld [vmem:[#allocation13 + $0x180] sm:$0xff]  ;;  %v334_v43 = vld [vmem:[#allocation13 + $0x168] sm:$0xff]  ;;  %v344_v9 = vld [vmem:[#allocation13 + $0x1b8] sm:$0xff] }
  0x5a   :  { %604 = vmatprep.subr.mxu0 %v866_v0  ;;  %639 = vmatprep.subr.mxu1 %v866_v0  ;;  %v333_v44 = vld [vmem:[#allocation13 + $0x160] sm:$0xff]  ;;  %v330_v45 = vld [vmem:[#allocation13 + $0x148] sm:$0xff]  ;;  %v343_v10 = vld [vmem:[#allocation13 + $0x1b0] sm:$0xff] }
  0x5b   :  { %605 = vmatpush3.msra.mxu0 %v122_v13  ;;  %640 = vmatpush3.msra.mxu1 %v210_v18  ;;  %v329_v46 = vld [vmem:[#allocation13 + $0x140] sm:$0xff]  ;;  %v326_v47 = vld [vmem:[#allocation13 + $0x128] sm:$0xff]  ;;  %v340_v11 = vld [vmem:[#allocation13 + $0x198] sm:$0xff] }
  0x5c   :  { %606 = vmatprep.subr.mxu0 %v866_v0  ;;  %641 = vmatprep.subr.mxu1 %v866_v0  ;;  %v325_v48 = vld [vmem:[#allocation13 + $0x120] sm:$0xff]  ;;  %v322_v49 = vld [vmem:[#allocation13 + $0x108] sm:$0xff]  ;;  %v339_v12 = vld [vmem:[#allocation13 + $0x190] sm:$0xff] }
  0x5d   :  { %607 = vmatpush3.msra.mxu0 %v121_v15  ;;  %642 = vmatpush3.msra.mxu1 %v209_v20  ;;  %v321_v50 = vld [vmem:[#allocation13 + $0x100] sm:$0xff]  ;;  %v318_v51 = vld [vmem:[#allocation13 + $0xe8] sm:$0xff]  ;;  %v336_v13 = vld [vmem:[#allocation13 + $0x178] sm:$0xff] }
  0x5e   :  { %608 = vmatprep.subr.mxu0 %v866_v0  ;;  %643 = vmatprep.subr.mxu1 %v866_v0  ;;  %v317_v52 = vld [vmem:[#allocation13 + $0xe0] sm:$0xff]  ;;  %v314_v53 = vld [vmem:[#allocation13 + $0xc8] sm:$0xff]  ;;  %v335_v14 = vld [vmem:[#allocation13 + $0x170] sm:$0xff] }
  0x5f   :  { %609 = vmatpush3.msra.mxu0 %v120_v17  ;;  %644 = vmatpush3.msra.mxu1 %v208_v22  ;;  %v313_v54 = vld [vmem:[#allocation13 + $0xc0] sm:$0xff]  ;;  %v310_v55 = vld [vmem:[#allocation13 + $0xa8] sm:$0xff]  ;;  %v332_v15 = vld [vmem:[#allocation13 + $0x158] sm:$0xff] }
  0x60   :  { %610 = vmatprep.subr.mxu0 %v866_v0  ;;  %645 = vmatprep.subr.mxu1 %v866_v0  ;;  %v309_v56 = vld [vmem:[#allocation13 + $0xa0] sm:$0xff]  ;;  %v306_v57 = vld [vmem:[#allocation13 + $0x88] sm:$0xff]  ;;  %v331_v16 = vld [vmem:[#allocation13 + $0x150] sm:$0xff] }
  0x61   :  { %611 = vmatpush3.msra.mxu0 %v119_v19  ;;  %646 = vmatpush3.msra.mxu1 %v207_v24  ;;  %v305_v58 = vld [vmem:[#allocation13 + $0x80] sm:$0xff]  ;;  %v302_v59 = vld [vmem:[#allocation13 + $0x68] sm:$0xff]  ;;  %v328_v17 = vld [vmem:[#allocation13 + $0x138] sm:$0xff] }
  0x62   :  { %612 = vmatprep.subr.mxu0 %v866_v0  ;;  %647 = vmatprep.subr.mxu1 %v866_v0  ;;  %v301_v60 = vld [vmem:[#allocation13 + $0x60] sm:$0xff]  ;;  %v298_v61 = vld [vmem:[#allocation13 + $0x48] sm:$0xff]  ;;  %v327_v18 = vld [vmem:[#allocation13 + $0x130] sm:$0xff] }
  0x63   :  { %613 = vmatpush3.msra.mxu0 %v118_v21  ;;  %648 = vmatpush3.msra.mxu1 %v206_v26  ;;  %v297_v62 = vld [vmem:[#allocation13 + $0x40] sm:$0xff]  ;;  %v294_v63 = vld [vmem:[#allocation13 + $0x28] sm:$0xff]  ;;  %v323_v19 = vld [vmem:[#allocation13 + $0x110] sm:$0xff] }
  0x64   :  { %614 = vmatprep.subr.mxu0 %v866_v0  ;;  %649 = vmatprep.subr.mxu1 %v866_v0  ;;  %v113_v1 = vld [vmem:[#allocation4] sm:$0xff]  ;;  %v320_v20 = vld [vmem:[#allocation13 + $0xf8] sm:$0xff]  ;;  %v319_v21 = vld [vmem:[#allocation13 + $0xf0] sm:$0xff] }
  0x65   :  { %615 = vmatpush3.msra.mxu0 %v117_v23  ;;  %650 = vmatpush3.msra.mxu1 %v205_v28  ;;  %v316_v22 = vld [vmem:[#allocation13 + $0xd8] sm:$0xff]  ;;  %v315_v23 = vld [vmem:[#allocation13 + $0xd0] sm:$0xff] }
  0x66   :  { %616 = vmatprep.subr.mxu0 %v866_v0  ;;  %651 = vmatprep.subr.mxu1 %v866_v0  ;;  %v312_v24 = vld [vmem:[#allocation13 + $0xb8] sm:$0xff] }
  0x67   :  { %617 = vmatpush3.msra.mxu0 %v116_v25  ;;  %652 = vmatpush3.msra.mxu1 %v204_v31  ;;  %v311_v25 = vld [vmem:[#allocation13 + $0xb0] sm:$0xff]  ;;  %v308_v26 = vld [vmem:[#allocation13 + $0x98] sm:$0xff] }
  0x68   :  { %618 = vmatprep.subr.mxu0 %v866_v0  ;;  %653 = vmatprep.subr.mxu1 %v866_v0  ;;  %v304_v28 = vld [vmem:[#allocation13 + $0x78] sm:$0xff]  ;;  %v299_v31 = vld [vmem:[#allocation13 + $0x50] sm:$0xff] }
  0x69   :  { %619 = vmatpush3.msra.mxu0 %v115_v27  ;;  %654 = vmatpush3.msra.mxu1 %v203_v32  ;;  %v307_v27 = vld [vmem:[#allocation13 + $0x90] sm:$0xff]  ;;  %v296_v32 = vld [vmem:[#allocation13 + $0x38] sm:$0xff] }
  0x6a   :  { %620 = vmatprep.subr.mxu0 %v866_v0  ;;  %655 = vmatprep.subr.mxu1 %v866_v0 }
  0x6b   :  { %621 = vmatpush3.msra.mxu0 %v114_v29  ;;  %656 = vmatpush3.msra.mxu1 %v202_v33  ;;  %v303_v29 = vld [vmem:[#allocation13 + $0x70] sm:$0xff]  ;;  %v293_v33 = vld [vmem:[#allocation13 + $0x20] sm:$0xff] }
  0x6c   :  { %623 = vmatmul.mubr.f32.vlgmr.msra.gmra.mxu0 %v107_v30  ;;  %353 = vmatprep.subr.mxu0 %v350_v34  ;;  %v300_v30 = vld [vmem:[#allocation13 + $0x58] sm:$0xff]  ;;  %v295_v34 = vld [vmem:[#allocation13 + $0x30] sm:$0xff] }
  0x6d   :  { %417 = vmatprep.mubr.f32.mxu0 %v866_v0  ;;  %424 = vmatprep.subr.mxu1 %v352_v35  ;;  %v290_v35 = vld [vmem:[#allocation13 + $0x8] sm:$0xff] }
  0x6e   :  { %354 = vmatpush1.msra.mxu0 %v349_v36  ;;  %v292_v36 = vld [vmem:[#allocation13 + $0x18] sm:$0xff] }
  0x6f   :  { %355 = vmatprep.subr.mxu0 %v346_v37  ;;  %v289_v37 = vld [vmem:[#allocation13] sm:$0xff] }
  0x70   :  { %356 = vmatpush1.msra.mxu0 %v345_v38  ;;  %v291_v38 = vld [vmem:[#allocation13 + $0x10] sm:$0xff] }
  0x71   :  { %357 = vmatprep.subr.mxu0 %v342_v39 }
  0x72   :  { %358 = vmatpush1.msra.mxu0 %v341_v40 }
  0x73   :  { %359 = vmatprep.subr.mxu0 %v338_v41 }
  0x74   :  { %360 = vmatpush1.msra.mxu0 %v337_v42 }
  0x75   :  { %361 = vmatprep.subr.mxu0 %v334_v43 }
  0x76   :  { %362 = vmatpush1.msra.mxu0 %v333_v44 }
  0x77   :  { %363 = vmatprep.subr.mxu0 %v330_v45 }
  0x78   :  { %364 = vmatpush1.msra.mxu0 %v329_v46 }
  0x79   :  { %365 = vmatprep.subr.mxu0 %v326_v47 }
  0x7a   :  { %366 = vmatpush1.msra.mxu0 %v325_v48 }
  0x7b   :  { %367 = vmatprep.subr.mxu0 %v322_v49 }
  0x7c   :  { %368 = vmatpush1.msra.mxu0 %v321_v50 }
  0x7d   :  { %369 = vmatprep.subr.mxu0 %v318_v51 }
  0x7e   :  { %370 = vmatpush1.msra.mxu0 %v317_v52 }
  0x7f   :  { %371 = vmatprep.subr.mxu0 %v314_v53 }
  0x80   :  { %372 = vmatpush1.msra.mxu0 %v313_v54 }
  0x81   :  { %373 = vmatprep.subr.mxu0 %v310_v55 }
  0x82   :  { %374 = vmatpush1.msra.mxu0 %v309_v56 }
  0x83   :  { %375 = vmatprep.subr.mxu0 %v306_v57 }
  0x84   :  { %376 = vmatpush1.msra.mxu0 %v305_v58  ;;  %v109_v58 = vld [vmem:[#allocation9] sm:$0xff] }
  0x85   :  { %377 = vmatprep.subr.mxu0 %v302_v59 }
  0x86   :  { %378 = vmatpush1.msra.mxu0 %v301_v60 }
  0x87   :  { %379 = vmatprep.subr.mxu0 %v298_v61 }
  0x88   :  { %380 = vmatpush1.msra.mxu0 %v297_v62 }
  0x89   :  { %381 = vmatprep.subr.mxu0 %v294_v63 }
  0x8a   :  { %382 = vmatpush1.msra.mxu0 %v293_v33 }
  0x8b   :  { %383 = vmatprep.subr.mxu0 %v290_v35 }
  0x8c   :  { %384 = vmatpush1.msra.mxu0 %v289_v37 }
 0x12c   :  { %v196_v2 = vpop.f32.mrf.mxu0 }
 0x12d   :  { %v200_v3 = vadd.f32 %v196_v2, %v113_v1 }
 0x12e   :  { %v624_v4 = vpop.f32.mrf.mxu0 }
 0x12f   :  { %v201_v5 = vmax.f32 %v200_v3, 0.0 }
 0x131   :  { %658 = vmatmul.mubr.f32.vlgmr.msra.gmra.mxu1 %v201_v5 }
 0x132   :  { %425 = vmatpush1.msra.mxu1 %v351_v6  ;;  %488 = vmatprep.mubr.f32.mxu1 %v866_v0  ;;  %v324_v0 = vld [vmem:[#allocation13 + $0x118] sm:$0xff] }
 0x133   :  { %426 = vmatprep.subr.mxu1 %v348_v7 }
 0x134   :  { %427 = vmatpush1.msra.mxu1 %v347_v8 }
 0x135   :  { %428 = vmatprep.subr.mxu1 %v344_v9 }
 0x136   :  { %429 = vmatpush1.msra.mxu1 %v343_v10 }
 0x137   :  { %430 = vmatprep.subr.mxu1 %v340_v11 }
 0x138   :  { %431 = vmatpush1.msra.mxu1 %v339_v12 }
 0x139   :  { %432 = vmatprep.subr.mxu1 %v336_v13 }
 0x13a   :  { %433 = vmatpush1.msra.mxu1 %v335_v14 }
 0x13b   :  { %434 = vmatprep.subr.mxu1 %v332_v15 }
 0x13c   :  { %435 = vmatpush1.msra.mxu1 %v331_v16 }
 0x13d   :  { %436 = vmatprep.subr.mxu1 %v328_v17 }
 0x13e   :  { %437 = vmatpush1.msra.mxu1 %v327_v18 }
 0x13f   :  { %438 = vmatprep.subr.mxu1 %v324_v0 }
 0x140   :  { %439 = vmatpush1.msra.mxu1 %v323_v19 }
 0x141   :  { %440 = vmatprep.subr.mxu1 %v320_v20 }
 0x142   :  { %441 = vmatpush1.msra.mxu1 %v319_v21 }
 0x143   :  { %442 = vmatprep.subr.mxu1 %v316_v22 }
 0x144   :  { %443 = vmatpush1.msra.mxu1 %v315_v23 }
 0x145   :  { %444 = vmatprep.subr.mxu1 %v312_v24 }
 0x146   :  { %445 = vmatpush1.msra.mxu1 %v311_v25 }
 0x147   :  { %446 = vmatprep.subr.mxu1 %v308_v26 }
 0x148   :  { %447 = vmatpush1.msra.mxu1 %v307_v27 }
 0x149   :  { %448 = vmatprep.subr.mxu1 %v304_v28 }
 0x14a   :  { %449 = vmatpush1.msra.mxu1 %v303_v29 }
 0x14b   :  { %450 = vmatprep.subr.mxu1 %v300_v30 }
 0x14c   :  { %451 = vmatpush1.msra.mxu1 %v299_v31 }
 0x14d   :  { %452 = vmatprep.subr.mxu1 %v296_v32 }
 0x14e   :  { %453 = vmatpush1.msra.mxu1 %v295_v34 }
 0x14f   :  { %454 = vmatprep.subr.mxu1 %v292_v36 }
 0x150   :  { %455 = vmatpush1.msra.mxu1 %v291_v38 }
 0x1f1   :  { %v284_v39 = vpop.f32.mrf.mxu1 }
 0x1f2   :  { %v288_v40 = vmax.f32 %v284_v39, 0.0 }
 0x1f3   :  { %v659_v41 = vpop.f32.mrf.mxu1 }
 0x1f4   :  { %418 = vmatmul.mubr.f32.vlgmr.msra.gmra.mxu0 %v288_v40  ;;  %489 = vmatmul.mubr.f32.vlgmr.msra.gmra.mxu1 %v288_v40 }
 0x2b4   :  { %v419_v42 = vpop.f32.mrf.mxu0  ;;  %v490_v43 = vpop.f32.mrf.mxu1 }
 0x2b5   :  { %v495_v44 = vmax.f32 %v419_v42, 0.0  ;;  %v497_v51 = vmax.f32 %v490_v43, 0.0 }
 0x2b6   :  { %v421_v45 = vpop.f32.mrf.mxu0  ;;  %v492_v48 = vpop.f32.mrf.mxu1 }
 0x2b7   :  { %v499_v46 = vmul.f32 0.5, %v495_v44  ;;  %v496_v47 = vmax.f32 %v421_v45, 0.0  ;;  %v498_v50 = vmax.f32 %v492_v48, 0.0  ;;  %v507_v52 = vmul.f32 0.5, %v497_v51 }
 0x2b9   :  { %674 = vtanh.f32 %v499_v46  ;;  %v503_v49 = vmul.f32 0.5, %v496_v47 }
 0x2bb   :  { %676 = vtanh.f32 %v503_v49 }
 0x2bc   :  { %678 = vtanh.f32 %v498_v50 }
 0x2bd   :  { %680 = vtanh.f32 %v507_v52 }
 0x2c6   :  { %v675_v53 = vpop.eup %674 }
 0x2c7   :  { %v501_v54 = vadd.f32 1.0, %v675_v53 }
 0x2c8   :  { %v677_v55 = vpop.eup %676 }
 0x2c9   :  { %v502_v56 = vmul.f32 0.5, %v501_v54  ;;  %v505_v57 = vadd.f32 1.0, %v677_v55  ;;  %v679_v60 = vpop.eup %678 }
 0x2cb   :  { %v506_v59 = vmul.f32 0.5, %v505_v57  ;;  %v513_v62 = vmul.f32 %v679_v60, %v502_v56 }
 0x2cd   :  { %v512_v61 = vmul.f32 %v506_v59, %v109_v58 }
 0x2cf   :  { %v514_v63 = vadd.f32 %v513_v62, %v512_v61 }
 0x2d1   :  { %523 = vst [vmem:[#allocation16] sm:$0xff] %v514_v63  ;;  %682 = vtanh.f32 %v514_v63 }
 0x2d2   :  { %815 = shalt.err (!%p812_p6)
}
 0x2d3   :  { %543 = dma.vmem_to_hbm [thread:$0]  %s541_s5, 128, %s983_s7, [#allocation17]   ;;  %v681_v1 = vpop.eup %680 }
 0x2d4   :  { %v509_v2 = vadd.f32 1.0, %v681_v1  ;;  %s869_s11 = smov [#allocation15]  }
 0x2d5   :  { %s530_s12 = sshll.u32 %s869_s11, 4  ;;  %s531_s12 = int_to_ptr.vmem [resolvable:$true] %s530_s12 }
 0x2d6   :  { %v510_v3 = vmul.f32 0.5, %v509_v2  ;;  %s824_s13 = scalar_lea.vmem %s531_s12, 128  ;;  %p829_p8 = scmp.lt.s32.totalorder %s531_s12, %s531_s12 }
 0x2d7   :  { %p825_p7 = scmp.ne.s32.totalorder %s531_s12, %s824_s13  ;;  %p830_p9 = scmp.lt.s32.totalorder %s824_s13, %s824_s13 }
 0x2d9   :  { %p831_p10 = por %p830_p9, %p829_p8 }
 0x2db   :  { %p832_p11 = pnand %p831_p10, %p825_p7 }
 0x2de   :  { %v683_v4 = vpop.eup %682 }
 0x2df   :  { %v516_v5 = vmul.f32 %v683_v4, %v510_v3 }
 0x2e1   :  { %517 = vst [vmem:[#allocation15] sm:$0xff] %v516_v5 }
 0x2e2   :  { %835 = shalt.err (!%p832_p11)
}
 0x2e3   :  { %533 = dma.vmem_to_hbm [thread:$0]  %s531_s12, 128, %s982_s6, [#allocation6]  }
 0x2e4   :  { %852 = dma.done.wait [#allocation6], 128  }
 0x2e5   :  { %853 = vsyncadd [#allocation6], 4294967168 }
 0x2e6   :  { %854 = dma.done.wait [#allocation17], 128  }
 0x2e7   :  { %855 = vsyncadd [#allocation17], 4294967168 }
 0x2e8   :  { %550 = vsyncpa [#allocation5], 1 }
 0x2e9   :  { %551 = vsyncpa [#allocation8], 1 }
 0x2ea   :  { %552 = vsyncpa [#allocation11], 1 }
 0x2eb   :  { %553 = vsyncpa [#allocation14], 1 }
 0x2ec   :  { %554 = vsyncpa [#allocation6], 1 }
 0x2ed   :  { %555 = vsyncpa [#allocation17], 1 }

// kernel: tpu_custom_call.1
= control target key start
LH: loop header
LB: loop body
LE: loop exit
PB: predicated region body
PF: predicated region fallthrough
CT: control target
= control target key end

     0   :  { %13 = vsyncpa [#allocation5], 0  ;;  %s976_s0 = inlined_call_operand.hbm [shape: f32[1,8,128], index: 0, kind: input, shape index: {}]   ;;  %s977_s1 = inlined_call_operand.hbm [shape: f32[8,128], index: 1, kind: input, shape index: {}]   ;;  %s978_s2 = inlined_call_operand.hbm [shape: f32[8,128], index: 2, kind: input, shape index: {}]   ;;  %s979_s3 = inlined_call_operand.hbm [shape: f32[128,128], index: 3, kind: input, shape index: {}]   ;;  %s980_s4 = inlined_call_operand.hbm [shape: f32[128,128], index: 4, kind: input, shape index: {}]   ;;  %s981_s5 = inlined_call_operand.hbm [shape: f32[128,512], index: 5, kind: input, shape index: {}]   ;;  %s982_s6 = inlined_call_operand.hbm [shape: f32[1,8,128], index: 6, kind: output, shape index: {0}]   ;;  %s983_s7 = inlined_call_operand.hbm [shape: f32[8,128], index: 7, kind: output, shape index: {1}]  }
   0x1   :  { %14 = vsyncpa [#allocation8], 0 }
   0x2   :  { %15 = vsyncpa [#allocation11], 0 }
   0x3   :  { %16 = vsyncpa [#allocation14], 0 }
   0x4   :  { %17 = vsyncpa [#allocation6], 0 }
   0x5   :  { %18 = vsyncpa [#allocation17], 0  ;;  %s856_s24 = smov [#allocation7]   ;;  %s857_s26 = smov [#allocation10]  }
   0x6   :  { %s35_s25 = sshll.u32 %s856_s24, 4  ;;  %s54_s27 = sshll.u32 %s857_s26, 4  ;;  %s36_s25 = int_to_ptr.vmem [resolvable:$true] %s35_s25  ;;  %s55_s27 = int_to_ptr.vmem [resolvable:$true] %s54_s27 }
   0x7   :  { %s692_s28 = scalar_lea.vmem %s36_s25, 128  ;;  %p697_p1 = scmp.lt.s32.totalorder %s36_s25, %s36_s25 }
   0x8   :  { %p693_p0 = scmp.ne.s32.totalorder %s36_s25, %s692_s28  ;;  %p698_p2 = scmp.lt.s32.totalorder %s692_s28, %s692_s28 }
   0xa   :  { %p699_p3 = por %p698_p2, %p697_p1 }
   0xc   :  { %p700_p4 = pnand %p699_p3, %p693_p0 }
   0xe   :  { %703 = shalt.err (!%p700_p4)
}
   0xf   :  { %38 = dma.hbm_to_vmem [thread:$0]  %s977_s1, 128, %s36_s25, [#allocation8]  }
  0x10   :  { %s712_s8 = scalar_lea.vmem %s55_s27, 2048  ;;  %p717_p6 = scmp.lt.s32.totalorder %s55_s27, %s55_s27 }
  0x11   :  { %p713_p5 = scmp.ne.s32.totalorder %s55_s27, %s712_s8  ;;  %p718_p7 = scmp.lt.s32.totalorder %s712_s8, %s712_s8 }
  0x13   :  { %p719_p8 = por %p718_p7, %p717_p6 }
  0x15   :  { %p720_p9 = pnand %p719_p8, %p713_p5 }
  0x17   :  { %723 = shalt.err (!%p720_p9)
}
  0x18   :  { %s858_s9 = smov 128   ;;  %s859_s10 = smov 8  }
  0x19   :  { %60 = dma.hbm_to_vmem [thread:$0]  %s979_s3, 2048, %s55_s27, [#allocation11], %s858_s9, %s858_s9, %s859_s10  }
  0x1a   :  { %s860_s13 = smov [#allocation4]   ;;  %s861_s15 = smov [#allocation9]  }
  0x1b   :  { %s25_s14 = sshll.u32 %s860_s13, 4  ;;  %s45_s1 = sshll.u32 %s861_s15, 4  ;;  %s26_s14 = int_to_ptr.vmem [resolvable:$true] %s25_s14  ;;  %s46_s1 = int_to_ptr.vmem [resolvable:$true] %s45_s1 }
  0x1c   :  { %s732_s16 = scalar_lea.vmem %s26_s14, 128  ;;  %p737_p11 = scmp.lt.s32.totalorder %s26_s14, %s26_s14 }
  0x1d   :  { %p733_p10 = scmp.ne.s32.totalorder %s26_s14, %s732_s16  ;;  %p738_p12 = scmp.lt.s32.totalorder %s732_s16, %s732_s16 }
  0x1f   :  { %p739_p13 = por %p738_p12, %p737_p11 }
  0x21   :  { %p740_p0 = pnand %p739_p13, %p733_p10 }
  0x23   :  { %743 = shalt.err (!%p740_p0)
}
  0x24   :  { %28 = dma.hbm_to_vmem [thread:$0]  %s976_s0, 128, %s26_s14, [#allocation5]  }
  0x25   :  { %s752_s19 = scalar_lea.vmem %s46_s1, 128  ;;  %p757_p2 = scmp.lt.s32.totalorder %s46_s1, %s46_s1 }
  0x26   :  { %p753_p1 = scmp.ne.s32.totalorder %s46_s1, %s752_s19  ;;  %p758_p3 = scmp.lt.s32.totalorder %s752_s19, %s752_s19 }
  0x28   :  { %p759_p4 = por %p758_p3, %p757_p2 }
  0x2a   :  { %p760_p5 = pnand %p759_p4, %p753_p1 }
  0x2c   :  { %763 = shalt.err (!%p760_p5)
}
  0x2d   :  { %48 = dma.hbm_to_vmem [thread:$0]  %s978_s2, 128, %s46_s1, [#allocation8]  }
  0x2e   :  { %s862_s21 = smov [#allocation12]   ;;  %s863_s23 = smov [#allocation13]  }
  0x2f   :  { %s66_s22 = sshll.u32 %s862_s21, 4  ;;  %s78_s24 = sshll.u32 %s863_s23, 4  ;;  %s67_s22 = int_to_ptr.vmem [resolvable:$true] %s66_s22  ;;  %s79_s24 = int_to_ptr.vmem [resolvable:$true] %s78_s24 }
  0x30   :  { %s772_s25 = scalar_lea.vmem %s67_s22, 2048  ;;  %p777_p7 = scmp.lt.s32.totalorder %s67_s22, %s67_s22 }
  0x31   :  { %p773_p6 = scmp.ne.s32.totalorder %s67_s22, %s772_s25  ;;  %p778_p8 = scmp.lt.s32.totalorder %s772_s25, %s772_s25 }
  0x33   :  { %p779_p9 = por %p778_p8, %p777_p7 }
  0x35   :  { %p780_p10 = pnand %p779_p9, %p773_p6 }
  0x37   :  { %783 = shalt.err (!%p780_p10)
}
  0x38   :  { %72 = dma.hbm_to_vmem [thread:$0]  %s980_s4, 2048, %s67_s22, [#allocation11], %s858_s9, %s858_s9, %s859_s10  }
  0x39   :  { %s792_s2 = scalar_lea.vmem %s79_s24, 8192  ;;  %p797_p12 = scmp.lt.s32.totalorder %s79_s24, %s79_s24 }
  0x3a   :  { %p793_p11 = scmp.ne.s32.totalorder %s79_s24, %s792_s2  ;;  %p798_p13 = scmp.lt.s32.totalorder %s792_s2, %s792_s2 }
  0x3c   :  { %p799_p0 = por %p798_p13, %p797_p12 }
  0x3e   :  { %p800_p1 = pnand %p799_p0, %p793_p11 }
  0x40   :  { %803 = shalt.err (!%p800_p1)
}
  0x41   :  { %s864_s27 = smov 512   ;;  %s865_s28 = smov 32  }
  0x42   :  { %84 = dma.hbm_to_vmem [thread:$0]  %s981_s5, 8192, %s79_s24, [#allocation14], %s864_s27, %s864_s27, %s865_s28  }
  0x43   :  { %844 = dma.done.wait [#allocation5], 128  }
  0x44   :  { %845 = vsyncadd [#allocation5], 4294967168 }
  0x45   :  { %846 = dma.done.wait [#allocation8], 256  }
  0x46   :  { %847 = vsyncadd [#allocation8], 4294967040 }
  0x47   :  { %848 = dma.done.wait [#allocation11], 4096  }
  0x48   :  { %849 = vsyncadd [#allocation11], 4294963200 }
  0x49   :  { %850 = dma.done.wait [#allocation14], 8192  }
  0x4a   :  { %851 = vsyncadd [#allocation14], 4294959104  ;;  %v866_v0 = vmov 0.0   ;;  %vm867_vm0 = vmmov 0   ;;  %v129_v1 = vld [vmem:[#allocation10 + $0x78] sm:$0xff]  ;;  %v128_v2 = vld [vmem:[#allocation10 + $0x70] sm:$0xff] }
  0x4b   :  { %590 = vmatprep.subr.mxu0 %v866_v0  ;;  %622 = vmatprep.mubr.msk.f32.mxu0 %vm867_vm0, %v866_v0  ;;  %v127_v3 = vld [vmem:[#allocation10 + $0x68] sm:$0xff]  ;;  %v126_v4 = vld [vmem:[#allocation10 + $0x60] sm:$0xff]  ;;  %v217_v5 = vld [vmem:[#allocation12 + $0x78] sm:$0xff]  ;;  %s868_s4 = smov [#allocation16]  }
  0x4c   :  { %625 = vmatprep.subr.mxu1 %v866_v0  ;;  %657 = vmatprep.mubr.msk.f32.mxu1 %vm867_vm0, %v866_v0  ;;  %v125_v6 = vld [vmem:[#allocation10 + $0x58] sm:$0xff]  ;;  %v216_v7 = vld [vmem:[#allocation12 + $0x70] sm:$0xff]  ;;  %v215_v8 = vld [vmem:[#allocation12 + $0x68] sm:$0xff]  ;;  %s540_s5 = sshll.u32 %s868_s4, 4  ;;  %s541_s5 = int_to_ptr.vmem [resolvable:$true] %s540_s5 }
  0x4d   :  { %591 = vmatpush3.msra.mxu0 %v129_v1  ;;  %626 = vmatpush3.msra.mxu1 %v217_v5  ;;  %v124_v9 = vld [vmem:[#allocation10 + $0x50] sm:$0xff]  ;;  %v214_v10 = vld [vmem:[#allocation12 + $0x60] sm:$0xff]  ;;  %v123_v11 = vld [vmem:[#allocation10 + $0x48] sm:$0xff]  ;;  %s804_s8 = scalar_lea.vmem %s541_s5, 128  ;;  %p809_p3 = scmp.lt.s32.totalorder %s541_s5, %s541_s5 }
  0x4e   :  { %592 = vmatprep.subr.mxu0 %v866_v0  ;;  %627 = vmatprep.subr.mxu1 %v866_v0  ;;  %v213_v12 = vld [vmem:[#allocation12 + $0x58] sm:$0xff]  ;;  %v122_v13 = vld [vmem:[#allocation10 + $0x40] sm:$0xff]  ;;  %v212_v14 = vld [vmem:[#allocation12 + $0x50] sm:$0xff]  ;;  %p805_p2 = scmp.ne.s32.totalorder %s541_s5, %s804_s8  ;;  %p810_p4 = scmp.lt.s32.totalorder %s804_s8, %s804_s8 }
  0x4f   :  { %593 = vmatpush3.msra.mxu0 %v128_v2  ;;  %628 = vmatpush3.msra.mxu1 %v216_v7  ;;  %v121_v15 = vld [vmem:[#allocation10 + $0x38] sm:$0xff]  ;;  %v211_v16 = vld [vmem:[#allocation12 + $0x48] sm:$0xff]  ;;  %v120_v17 = vld [vmem:[#allocation10 + $0x30] sm:$0xff] }
  0x50   :  { %594 = vmatprep.subr.mxu0 %v866_v0  ;;  %629 = vmatprep.subr.mxu1 %v866_v0  ;;  %v210_v18 = vld [vmem:[#allocation12 + $0x40] sm:$0xff]  ;;  %v119_v19 = vld [vmem:[#allocation10 + $0x28] sm:$0xff]  ;;  %v209_v20 = vld [vmem:[#allocation12 + $0x38] sm:$0xff]  ;;  %p811_p5 = por %p810_p4, %p809_p3 }
  0x51   :  { %595 = vmatpush3.msra.mxu0 %v127_v3  ;;  %630 = vmatpush3.msra.mxu1 %v215_v8  ;;  %v118_v21 = vld [vmem:[#allocation10 + $0x20] sm:$0xff]  ;;  %v208_v22 = vld [vmem:[#allocation12 + $0x30] sm:$0xff]  ;;  %v117_v23 = vld [vmem:[#allocation10 + $0x18] sm:$0xff] }
  0x52   :  { %596 = vmatprep.subr.mxu0 %v866_v0  ;;  %631 = vmatprep.subr.mxu1 %v866_v0  ;;  %v207_v24 = vld [vmem:[#allocation12 + $0x28] sm:$0xff]  ;;  %v116_v25 = vld [vmem:[#allocation10 + $0x10] sm:$0xff]  ;;  %v206_v26 = vld [vmem:[#allocation12 + $0x20] sm:$0xff]  ;;  %p812_p6 = pnand %p811_p5, %p805_p2 }
  0x53   :  { %597 = vmatpush3.msra.mxu0 %v126_v4  ;;  %632 = vmatpush3.msra.mxu1 %v214_v10  ;;  %v115_v27 = vld [vmem:[#allocation10 + $0x8] sm:$0xff]  ;;  %v205_v28 = vld [vmem:[#allocation12 + $0x18] sm:$0xff]  ;;  %v114_v29 = vld [vmem:[#allocation10] sm:$0xff] }
  0x54   :  { %598 = vmatprep.subr.mxu0 %v866_v0  ;;  %633 = vmatprep.subr.mxu1 %v866_v0  ;;  %v107_v30 = vld [vmem:[#allocation7] sm:$0xff]  ;;  %v203_v32 = vld [vmem:[#allocation12 + $0x8] sm:$0xff]  ;;  %v202_v33 = vld [vmem:[#allocation12] sm:$0xff] }
  0x55   :  { %599 = vmatpush3.msra.mxu0 %v125_v6  ;;  %634 = vmatpush3.msra.mxu1 %v213_v12  ;;  %v204_v31 = vld [vmem:[#allocation12 + $0x10] sm:$0xff]  ;;  %v350_v34 = vld [vmem:[#allocation13 + $0x1e8] sm:$0xff]  ;;  %v352_v35 = vld [vmem:[#allocation13 + $0x1f8] sm:$0xff] }
  0x56   :  { %600 = vmatprep.subr.mxu0 %v866_v0  ;;  %635 = vmatprep.subr.mxu1 %v866_v0  ;;  %v349_v36 = vld [vmem:[#allocation13 + $0x1e0] sm:$0xff]  ;;  %v346_v37 = vld [vmem:[#allocation13 + $0x1c8] sm:$0xff]  ;;  %v351_v6 = vld [vmem:[#allocation13 + $0x1f0] sm:$0xff] }
  0x57   :  { %601 = vmatpush3.msra.mxu0 %v124_v9  ;;  %636 = vmatpush3.msra.mxu1 %v212_v14  ;;  %v345_v38 = vld [vmem:[#allocation13 + $0x1c0] sm:$0xff]  ;;  %v342_v39 = vld [vmem:[#allocation13 + $0x1a8] sm:$0xff]  ;;  %v348_v7 = vld [vmem:[#allocation13 + $0x1d8] sm:$0xff] }
  0x58   :  { %602 = vmatprep.subr.mxu0 %v866_v0  ;;  %637 = vmatprep.subr.mxu1 %v866_v0  ;;  %v341_v40 = vld [vmem:[#allocation13 + $0x1a0] sm:$0xff]  ;;  %v338_v41 = vld [vmem:[#allocation13 + $0x188] sm:$0xff]  ;;  %v347_v8 = vld [vmem:[#allocation13 + $0x1d0] sm:$0xff] }
  0x59   :  { %603 = vmatpush3.msra.mxu0 %v123_v11  ;;  %638 = vmatpush3.msra.mxu1 %v211_v16  ;;  %v337_v42 = vld [vmem:[#allocation13 + $0x180] sm:$0xff]  ;;  %v334_v43 = vld [vmem:[#allocation13 + $0x168] sm:$0xff]  ;;  %v344_v9 = vld [vmem:[#allocation13 + $0x1b8] sm:$0xff] }
  0x5a   :  { %604 = vmatprep.subr.mxu0 %v866_v0  ;;  %639 = vmatprep.subr.mxu1 %v866_v0  ;;  %v333_v44 = vld [vmem:[#allocation13 + $0x160] sm:$0xff]  ;;  %v330_v45 = vld [vmem:[#allocation13 + $0x148] sm:$0xff]  ;;  %v343_v10 = vld [vmem:[#allocation13 + $0x1b0] sm:$0xff] }
  0x5b   :  { %605 = vmatpush3.msra.mxu0 %v122_v13  ;;  %640 = vmatpush3.msra.mxu1 %v210_v18  ;;  %v329_v46 = vld [vmem:[#allocation13 + $0x140] sm:$0xff]  ;;  %v326_v47 = vld [vmem:[#allocation13 + $0x128] sm:$0xff]  ;;  %v340_v11 = vld [vmem:[#allocation13 + $0x198] sm:$0xff] }
  0x5c   :  { %606 = vmatprep.subr.mxu0 %v866_v0  ;;  %641 = vmatprep.subr.mxu1 %v866_v0  ;;  %v325_v48 = vld [vmem:[#allocation13 + $0x120] sm:$0xff]  ;;  %v322_v49 = vld [vmem:[#allocation13 + $0x108] sm:$0xff]  ;;  %v339_v12 = vld [vmem:[#allocation13 + $0x190] sm:$0xff] }
  0x5d   :  { %607 = vmatpush3.msra.mxu0 %v121_v15  ;;  %642 = vmatpush3.msra.mxu1 %v209_v20  ;;  %v321_v50 = vld [vmem:[#allocation13 + $0x100] sm:$0xff]  ;;  %v318_v51 = vld [vmem:[#allocation13 + $0xe8] sm:$0xff]  ;;  %v336_v13 = vld [vmem:[#allocation13 + $0x178] sm:$0xff] }
  0x5e   :  { %608 = vmatprep.subr.mxu0 %v866_v0  ;;  %643 = vmatprep.subr.mxu1 %v866_v0  ;;  %v317_v52 = vld [vmem:[#allocation13 + $0xe0] sm:$0xff]  ;;  %v314_v53 = vld [vmem:[#allocation13 + $0xc8] sm:$0xff]  ;;  %v335_v14 = vld [vmem:[#allocation13 + $0x170] sm:$0xff] }
  0x5f   :  { %609 = vmatpush3.msra.mxu0 %v120_v17  ;;  %644 = vmatpush3.msra.mxu1 %v208_v22  ;;  %v313_v54 = vld [vmem:[#allocation13 + $0xc0] sm:$0xff]  ;;  %v310_v55 = vld [vmem:[#allocation13 + $0xa8] sm:$0xff]  ;;  %v332_v15 = vld [vmem:[#allocation13 + $0x158] sm:$0xff] }
  0x60   :  { %610 = vmatprep.subr.mxu0 %v866_v0  ;;  %645 = vmatprep.subr.mxu1 %v866_v0  ;;  %v309_v56 = vld [vmem:[#allocation13 + $0xa0] sm:$0xff]  ;;  %v306_v57 = vld [vmem:[#allocation13 + $0x88] sm:$0xff]  ;;  %v331_v16 = vld [vmem:[#allocation13 + $0x150] sm:$0xff] }
  0x61   :  { %611 = vmatpush3.msra.mxu0 %v119_v19  ;;  %646 = vmatpush3.msra.mxu1 %v207_v24  ;;  %v305_v58 = vld [vmem:[#allocation13 + $0x80] sm:$0xff]  ;;  %v302_v59 = vld [vmem:[#allocation13 + $0x68] sm:$0xff]  ;;  %v328_v17 = vld [vmem:[#allocation13 + $0x138] sm:$0xff] }
  0x62   :  { %612 = vmatprep.subr.mxu0 %v866_v0  ;;  %647 = vmatprep.subr.mxu1 %v866_v0  ;;  %v301_v60 = vld [vmem:[#allocation13 + $0x60] sm:$0xff]  ;;  %v298_v61 = vld [vmem:[#allocation13 + $0x48] sm:$0xff]  ;;  %v327_v18 = vld [vmem:[#allocation13 + $0x130] sm:$0xff] }
  0x63   :  { %613 = vmatpush3.msra.mxu0 %v118_v21  ;;  %648 = vmatpush3.msra.mxu1 %v206_v26  ;;  %v297_v62 = vld [vmem:[#allocation13 + $0x40] sm:$0xff]  ;;  %v294_v63 = vld [vmem:[#allocation13 + $0x28] sm:$0xff]  ;;  %v323_v19 = vld [vmem:[#allocation13 + $0x110] sm:$0xff] }
  0x64   :  { %614 = vmatprep.subr.mxu0 %v866_v0  ;;  %649 = vmatprep.subr.mxu1 %v866_v0  ;;  %v113_v1 = vld [vmem:[#allocation4] sm:$0xff]  ;;  %v320_v20 = vld [vmem:[#allocation13 + $0xf8] sm:$0xff]  ;;  %v319_v21 = vld [vmem:[#allocation13 + $0xf0] sm:$0xff] }
  0x65   :  { %615 = vmatpush3.msra.mxu0 %v117_v23  ;;  %650 = vmatpush3.msra.mxu1 %v205_v28  ;;  %v316_v22 = vld [vmem:[#allocation13 + $0xd8] sm:$0xff]  ;;  %v315_v23 = vld [vmem:[#allocation13 + $0xd0] sm:$0xff] }
  0x66   :  { %616 = vmatprep.subr.mxu0 %v866_v0  ;;  %651 = vmatprep.subr.mxu1 %v866_v0  ;;  %v312_v24 = vld [vmem:[#allocation13 + $0xb8] sm:$0xff] }
  0x67   :  { %617 = vmatpush3.msra.mxu0 %v116_v25  ;;  %652 = vmatpush3.msra.mxu1 %v204_v31  ;;  %v311_v25 = vld [vmem:[#allocation13 + $0xb0] sm:$0xff]  ;;  %v308_v26 = vld [vmem:[#allocation13 + $0x98] sm:$0xff] }
  0x68   :  { %618 = vmatprep.subr.mxu0 %v866_v0  ;;  %653 = vmatprep.subr.mxu1 %v866_v0  ;;  %v304_v28 = vld [vmem:[#allocation13 + $0x78] sm:$0xff]  ;;  %v299_v31 = vld [vmem:[#allocation13 + $0x50] sm:$0xff] }
  0x69   :  { %619 = vmatpush3.msra.mxu0 %v115_v27  ;;  %654 = vmatpush3.msra.mxu1 %v203_v32  ;;  %v307_v27 = vld [vmem:[#allocation13 + $0x90] sm:$0xff]  ;;  %v296_v32 = vld [vmem:[#allocation13 + $0x38] sm:$0xff] }
  0x6a   :  { %620 = vmatprep.subr.mxu0 %v866_v0  ;;  %655 = vmatprep.subr.mxu1 %v866_v0 }
  0x6b   :  { %621 = vmatpush3.msra.mxu0 %v114_v29  ;;  %656 = vmatpush3.msra.mxu1 %v202_v33  ;;  %v303_v29 = vld [vmem:[#allocation13 + $0x70] sm:$0xff]  ;;  %v293_v33 = vld [vmem:[#allocation13 + $0x20] sm:$0xff] }
  0x6c   :  { %623 = vmatmul.mubr.f32.vlgmr.msra.gmra.mxu0 %v107_v30  ;;  %353 = vmatprep.subr.mxu0 %v350_v34  ;;  %v300_v30 = vld [vmem:[#allocation13 + $0x58] sm:$0xff]  ;;  %v295_v34 = vld [vmem:[#allocation13 + $0x30] sm:$0xff] }
  0x6d   :  { %417 = vmatprep.mubr.f32.mxu0 %v866_v0  ;;  %424 = vmatprep.subr.mxu1 %v352_v35  ;;  %v290_v35 = vld [vmem:[#allocation13 + $0x8] sm:$0xff] }
  0x6e   :  { %354 = vmatpush1.msra.mxu0 %v349_v36  ;;  %v292_v36 = vld [vmem:[#allocation13 + $0x18] sm:$0xff] }
  0x6f   :  { %355 = vmatprep.subr.mxu0 %v346_v37  ;;  %v289_v37 = vld [vmem:[#allocation13] sm:$0xff] }
  0x70   :  { %356 = vmatpush1.msra.mxu0 %v345_v38  ;;  %v291_v38 = vld [vmem:[#allocation13 + $0x10] sm:$0xff] }
  0x71   :  { %357 = vmatprep.subr.mxu0 %v342_v39 }
  0x72   :  { %358 = vmatpush1.msra.mxu0 %v341_v40 }
  0x73   :  { %359 = vmatprep.subr.mxu0 %v338_v41 }
  0x74   :  { %360 = vmatpush1.msra.mxu0 %v337_v42 }
  0x75   :  { %361 = vmatprep.subr.mxu0 %v334_v43 }
  0x76   :  { %362 = vmatpush1.msra.mxu0 %v333_v44 }
  0x77   :  { %363 = vmatprep.subr.mxu0 %v330_v45 }
  0x78   :  { %364 = vmatpush1.msra.mxu0 %v329_v46 }
  0x79   :  { %365 = vmatprep.subr.mxu0 %v326_v47 }
  0x7a   :  { %366 = vmatpush1.msra.mxu0 %v325_v48 }
  0x7b   :  { %367 = vmatprep.subr.mxu0 %v322_v49 }
  0x7c   :  { %368 = vmatpush1.msra.mxu0 %v321_v50 }
  0x7d   :  { %369 = vmatprep.subr.mxu0 %v318_v51 }
  0x7e   :  { %370 = vmatpush1.msra.mxu0 %v317_v52 }
  0x7f   :  { %371 = vmatprep.subr.mxu0 %v314_v53 }
  0x80   :  { %372 = vmatpush1.msra.mxu0 %v313_v54 }
  0x81   :  { %373 = vmatprep.subr.mxu0 %v310_v55 }
  0x82   :  { %374 = vmatpush1.msra.mxu0 %v309_v56 }
  0x83   :  { %375 = vmatprep.subr.mxu0 %v306_v57 }
  0x84   :  { %376 = vmatpush1.msra.mxu0 %v305_v58  ;;  %v109_v58 = vld [vmem:[#allocation9] sm:$0xff] }
  0x85   :  { %377 = vmatprep.subr.mxu0 %v302_v59 }
  0x86   :  { %378 = vmatpush1.msra.mxu0 %v301_v60 }
  0x87   :  { %379 = vmatprep.subr.mxu0 %v298_v61 }
  0x88   :  { %380 = vmatpush1.msra.mxu0 %v297_v62 }
  0x89   :  { %381 = vmatprep.subr.mxu0 %v294_v63 }
  0x8a   :  { %382 = vmatpush1.msra.mxu0 %v293_v33 }
  0x8b   :  { %383 = vmatprep.subr.mxu0 %v290_v35 }
  0x8c   :  { %384 = vmatpush1.msra.mxu0 %v289_v37 }
 0x12c   :  { %v196_v2 = vpop.f32.mrf.mxu0 }
 0x12d   :  { %v200_v3 = vadd.f32 %v196_v2, %v113_v1 }
 0x12e   :  { %v624_v4 = vpop.f32.mrf.mxu0 }
 0x12f   :  { %v201_v5 = vmax.f32 %v200_v3, 0.0 }
 0x131   :  { %658 = vmatmul.mubr.f32.vlgmr.msra.gmra.mxu1 %v201_v5 }
 0x132   :  { %425 = vmatpush1.msra.mxu1 %v351_v6  ;;  %488 = vmatprep.mubr.f32.mxu1 %v866_v0  ;;  %v324_v0 = vld [vmem:[#allocation13 + $0x118] sm:$0xff] }
 0x133   :  { %426 = vmatprep.subr.mxu1 %v348_v7 }
 0x134   :  { %427 = vmatpush1.msra.mxu1 %v347_v8 }
 0x135   :  { %428 = vmatprep.subr.mxu1 %v344_v9 }
 0x136   :  { %429 = vmatpush1.msra.mxu1 %v343_v10 }
 0x137   :  { %430 = vmatprep.subr.mxu1 %v340_v11 }
 0x138   :  { %431 = vmatpush1.msra.mxu1 %v339_v12 }
 0x139   :  { %432 = vmatprep.subr.mxu1 %v336_v13 }
 0x13a   :  { %433 = vmatpush1.msra.mxu1 %v335_v14 }
 0x13b   :  { %434 = vmatprep.subr.mxu1 %v332_v15 }
 0x13c   :  { %435 = vmatpush1.msra.mxu1 %v331_v16 }
 0x13d   :  { %436 = vmatprep.subr.mxu1 %v328_v17 }
 0x13e   :  { %437 = vmatpush1.msra.mxu1 %v327_v18 }
 0x13f   :  { %438 = vmatprep.subr.mxu1 %v324_v0 }
 0x140   :  { %439 = vmatpush1.msra.mxu1 %v323_v19 }
 0x141   :  { %440 = vmatprep.subr.mxu1 %v320_v20 }
 0x142   :  { %441 = vmatpush1.msra.mxu1 %v319_v21 }
 0x143   :  { %442 = vmatprep.subr.mxu1 %v316_v22 }
 0x144   :  { %443 = vmatpush1.msra.mxu1 %v315_v23 }
 0x145   :  { %444 = vmatprep.subr.mxu1 %v312_v24 }
 0x146   :  { %445 = vmatpush1.msra.mxu1 %v311_v25 }
 0x147   :  { %446 = vmatprep.subr.mxu1 %v308_v26 }
 0x148   :  { %447 = vmatpush1.msra.mxu1 %v307_v27 }
 0x149   :  { %448 = vmatprep.subr.mxu1 %v304_v28 }
 0x14a   :  { %449 = vmatpush1.msra.mxu1 %v303_v29 }
 0x14b   :  { %450 = vmatprep.subr.mxu1 %v300_v30 }
 0x14c   :  { %451 = vmatpush1.msra.mxu1 %v299_v31 }
 0x14d   :  { %452 = vmatprep.subr.mxu1 %v296_v32 }
 0x14e   :  { %453 = vmatpush1.msra.mxu1 %v295_v34 }
 0x14f   :  { %454 = vmatprep.subr.mxu1 %v292_v36 }
 0x150   :  { %455 = vmatpush1.msra.mxu1 %v291_v38 }
 0x1f1   :  { %v284_v39 = vpop.f32.mrf.mxu1 }
 0x1f2   :  { %v288_v40 = vmax.f32 %v284_v39, 0.0 }
 0x1f3   :  { %v659_v41 = vpop.f32.mrf.mxu1 }
 0x1f4   :  { %418 = vmatmul.mubr.f32.vlgmr.msra.gmra.mxu0 %v288_v40  ;;  %489 = vmatmul.mubr.f32.vlgmr.msra.gmra.mxu1 %v288_v40 }
 0x2b4   :  { %v419_v42 = vpop.f32.mrf.mxu0  ;;  %v490_v43 = vpop.f32.mrf.mxu1 }
 0x2b5   :  { %v495_v44 = vmax.f32 %v419_v42, 0.0  ;;  %v497_v51 = vmax.f32 %v490_v43, 0.0 }
 0x2b6   :  { %v421_v45 = vpop.f32.mrf.mxu0  ;;  %v492_v48 = vpop.f32.mrf.mxu1 }
 0x2b7   :  { %v499_v46 = vmul.f32 0.5, %v495_v44  ;;  %v496_v47 = vmax.f32 %v421_v45, 0.0  ;;  %v498_v50 = vmax.f32 %v492_v48, 0.0  ;;  %v507_v52 = vmul.f32 0.5, %v497_v51 }
 0x2b9   :  { %674 = vtanh.f32 %v499_v46  ;;  %v503_v49 = vmul.f32 0.5, %v496_v47 }
 0x2bb   :  { %676 = vtanh.f32 %v503_v49 }
 0x2bc   :  { %678 = vtanh.f32 %v498_v50 }
 0x2bd   :  { %680 = vtanh.f32 %v507_v52 }
 0x2c6   :  { %v675_v53 = vpop.eup %674 }
 0x2c7   :  { %v501_v54 = vadd.f32 1.0, %v675_v53 }
 0x2c8   :  { %v677_v55 = vpop.eup %676 }
 0x2c9   :  { %v502_v56 = vmul.f32 0.5, %v501_v54  ;;  %v505_v57 = vadd.f32 1.0, %v677_v55  ;;  %v679_v60 = vpop.eup %678 }
 0x2cb   :  { %v506_v59 = vmul.f32 0.5, %v505_v57  ;;  %v513_v62 = vmul.f32 %v679_v60, %v502_v56 }
 0x2cd   :  { %v512_v61 = vmul.f32 %v506_v59, %v109_v58 }
 0x2cf   :  { %v514_v63 = vadd.f32 %v513_v62, %v512_v61 }
 0x2d1   :  { %523 = vst [vmem:[#allocation16] sm:$0xff] %v514_v63  ;;  %682 = vtanh.f32 %v514_v63 }
 0x2d2   :  { %815 = shalt.err (!%p812_p6)
}
 0x2d3   :  { %543 = dma.vmem_to_hbm [thread:$0]  %s541_s5, 128, %s983_s7, [#allocation17]   ;;  %v681_v1 = vpop.eup %680 }
 0x2d4   :  { %v509_v2 = vadd.f32 1.0, %v681_v1  ;;  %s869_s11 = smov [#allocation15]  }
 0x2d5   :  { %s530_s12 = sshll.u32 %s869_s11, 4  ;;  %s531_s12 = int_to_ptr.vmem [resolvable:$true] %s530_s12 }
 0x2d6   :  { %v510_v3 = vmul.f32 0.5, %v509_v2  ;;  %s824_s13 = scalar_lea.vmem %s531_s12, 128  ;;  %p829_p8 = scmp.lt.s32.totalorder %s531_s12, %s531_s12 }
 0x2d7   :  { %p825_p7 = scmp.ne.s32.totalorder %s531_s12, %s824_s13  ;;  %p830_p9 = scmp.lt.s32.totalorder %s824_s13, %s824_s13 }
 0x2d9   :  { %p831_p10 = por %p830_p9, %p829_p8 }
 0x2db   :  { %p832_p11 = pnand %p831_p10, %p825_p7 }
 0x2de   :  { %v683_v4 = vpop.eup %682 }
 0x2df   :  { %v516_v5 = vmul.f32 %v683_v4, %v510_v3 }
 0x2e1   :  { %517 = vst [vmem:[#allocation15] sm:$0xff] %v516_v5 }
 0x2e2   :  { %835 = shalt.err (!%p832_p11)
}
 0x2e3   :  { %533 = dma.vmem_to_hbm [thread:$0]  %s531_s12, 128, %s982_s6, [#allocation6]  }
 0x2e4   :  { %852 = dma.done.wait [#allocation6], 128  }
 0x2e5   :  { %853 = vsyncadd [#allocation6], 4294967168 }
 0x2e6   :  { %854 = dma.done.wait [#allocation17], 128  }
 0x2e7   :  { %855 = vsyncadd [#allocation17], 4294967168 }
 0x2e8   :  { %550 = vsyncpa [#allocation5], 1 }
 0x2e9   :  { %551 = vsyncpa [#allocation8], 1 }
 0x2ea   :  { %552 = vsyncpa [#allocation11], 1 }
 0x2eb   :  { %553 = vsyncpa [#allocation14], 1 }
 0x2ec   :  { %554 = vsyncpa [#allocation6], 1 }
 0x2ed   :  { %555 = vsyncpa [#allocation17], 1 }

</bundles_post_ra>
